<compile_context>
chip_gen: v6e
topology: v6e:2x2x1
jax: 0.10.0
libtpu: 0.0.40
codegen_flags: <defaults>
</compile_context>

<pallas_src>
import jax
import jax.numpy as jnp
import numpy as np
from jax.experimental import pallas as pl
from jax.experimental.pallas import tpu as pltpu

EPS = 1e-5
LANE = 128


def _round_up(x, m):
    return ((x + m - 1) // m) * m


def _pad_axis(a, axis, target):
    axis = axis % a.ndim
    pad = target - a.shape[axis]
    if pad == 0:
        return a
    cfg = [(0, 0)] * a.ndim
    cfg[axis] = (0, pad)
    return jnp.pad(a, cfg)


# ---------------------------------------------------------------------------
# Fused kernel: [optional BN-affine + ReLU on the input tile] -> zero-halo pad
# in VMEM -> 3x3 conv (9 MXU matmuls, bf16 in / f32 accumulate, bias-as-init)
# -> conv output tile + per-(batch, cout-tile) BN partial sums.
# ---------------------------------------------------------------------------
def _make_conv_kernel(H, W, cin, tcout, *, fuse_input, compute_dtype):
    def kernel(*refs):
        if fuse_input:
            (scale_ref, shift_ref, x_ref, w_ref, b_ref,
             y_ref, s_ref, ss_ref, xpad_ref, acc_ref) = refs
        else:
            (x_ref, w_ref, b_ref,
             y_ref, s_ref, ss_ref, xpad_ref, acc_ref) = refs

        # Stage the input tile into the zero-halo padded VMEM scratch, fusing
        # the previous layer's folded-BN affine + ReLU and the cast to the MXU
        # input dtype.  The memset provides the 1-pixel zero border.
        x = x_ref[0]                                        # (H, W, cin) f32
        if fuse_input:
            scale = scale_ref[...].reshape(1, 1, cin)
            shift = shift_ref[...].reshape(1, 1, cin)
            x = jnp.maximum(x * scale + shift, 0.0)
        xpad_ref[...] = jnp.zeros_like(xpad_ref)
        xpad_ref[1:H + 1, 1:W + 1, :] = x.astype(compute_dtype)

        # 3x3 "same" conv as 9 shifted 2-D matmuls on the MXU.  The f32 VMEM
        # accumulator is initialized with the broadcast bias.
        acc_ref[...] = jnp.broadcast_to(b_ref[...], (H * W, tcout))
        for dh in range(3):
            for dw in range(3):
                patch = xpad_ref[dh:dh + H, dw:dw + W, :].reshape(H * W, cin)
                acc_ref[...] += jnp.dot(patch, w_ref[dh, dw, :, :],
                                        preferred_element_type=jnp.float32)

        acc = acc_ref[...]
        y_ref[...] = acc.reshape(1, H, W, tcout)

        # Independent per-grid-step partial sums (keeps every grid axis
        # "parallel"); the tiny reduction over batch happens in JAX glue.
        s_ref[...] = jnp.sum(acc, axis=0, keepdims=True).reshape(1, 1, tcout)
        ss_ref[...] = jnp.sum(acc * acc, axis=0,
                              keepdims=True).reshape(1, 1, tcout)

    return kernel


def conv3x3_bn_stats(x, w, b, *, in_scale=None, in_shift=None,
                     compute_dtype=jnp.bfloat16, cout_tile=LANE):
    """3x3 same-conv + bias, emitting per-(batch, cout-tile) BN partial sums.

    x : (N, H, W, Cin) f32;  w : (3,3,Cin,Cout_pad) in compute_dtype;
    b : (Cout_pad,) f32;  in_scale/in_shift : optional (Cin,) folded-BN affine
    of the previous layer, applied (with ReLU) to the input tile in-kernel.
    """
    N, H, W, Cin = x.shape
    Cout = w.shape[-1]
    assert Cout % cout_tile == 0
    n_j = Cout // cout_tile
    fuse_input = in_scale is not None

    kernel = _make_conv_kernel(H, W, Cin, cout_tile,
                               fuse_input=fuse_input,
                               compute_dtype=compute_dtype)

    in_specs, args = [], []
    if fuse_input:
        in_specs += [pl.BlockSpec((1, Cin), lambda n, j: (0, 0)),
                     pl.BlockSpec((1, Cin), lambda n, j: (0, 0))]
        args += [in_scale.reshape(1, Cin).astype(jnp.float32),
                 in_shift.reshape(1, Cin).astype(jnp.float32)]
    in_specs += [
        pl.BlockSpec((1, H, W, Cin), lambda n, j: (n, 0, 0, 0)),
        pl.BlockSpec((3, 3, Cin, cout_tile), lambda n, j: (0, 0, 0, j)),
        pl.BlockSpec((1, cout_tile), lambda n, j: (0, j)),
    ]
    args += [x, w, b.reshape(1, Cout)]

    return pl.pallas_call(
        kernel,
        out_shape=(
            jax.ShapeDtypeStruct((N, H, W, Cout), jnp.float32),
            jax.ShapeDtypeStruct((N, 1, Cout), jnp.float32),
            jax.ShapeDtypeStruct((N, 1, Cout), jnp.float32),
        ),
        grid_spec=pltpu.PrefetchScalarGridSpec(
            num_scalar_prefetch=0,
            grid=(N, n_j),
            in_specs=in_specs,
            out_specs=[
                pl.BlockSpec((1, H, W, cout_tile), lambda n, j: (n, 0, 0, j)),
                pl.BlockSpec((1, 1, cout_tile), lambda n, j: (n, 0, j)),
                pl.BlockSpec((1, 1, cout_tile), lambda n, j: (n, 0, j)),
            ],
            scratch_shapes=[
                pltpu.VMEM((H + 2, W + 2, Cin), compute_dtype),  # padded tile
                pltpu.VMEM((H * W, cout_tile), jnp.float32),     # f32 accum
            ],
        ),
        compiler_params=pltpu.CompilerParams(
            dimension_semantics=("parallel", "parallel"),
            vmem_limit_bytes=64 * 1024 * 1024,
        ),
    )(*args)


# ---------------------------------------------------------------------------
# Final folded-BN affine + ReLU: one lane-dense, big-block elementwise pass.
# ---------------------------------------------------------------------------
def _affine_relu_kernel(y_ref, scale_ref, shift_ref, o_ref):
    o_ref[...] = jnp.maximum(y_ref[...] * scale_ref[...] + shift_ref[...], 0.0)


def affine_relu(y, scale, shift):
    N, H, W, C = y.shape
    rows = N * H * W
    y2 = y.reshape(rows, C)                      # free: contiguous NHWC
    tr = rows
    for cand in (4096, 2048, 1024, 512, 256, 128, 64, 32, 16, 8):
        if rows % cand == 0:
            tr = cand
            break
    out = pl.pallas_call(
        _affine_relu_kernel,
        out_shape=jax.ShapeDtypeStruct((rows, C), jnp.float32),
        grid_spec=pltpu.PrefetchScalarGridSpec(
            num_scalar_prefetch=0,
            grid=(rows // tr,),
            in_specs=[pl.BlockSpec((tr, C), lambda i: (i, 0)),
                      pl.BlockSpec((1, C), lambda i: (0, 0)),
                      pl.BlockSpec((1, C), lambda i: (0, 0))],
            out_specs=pl.BlockSpec((tr, C), lambda i: (i, 0)),
        ),
        compiler_params=pltpu.CompilerParams(
            dimension_semantics=("parallel",),
            vmem_limit_bytes=64 * 1024 * 1024),
    )(y2, scale.reshape(1, C), shift.reshape(1, C))
    return out.reshape(N, H, W, C)


# ---------------------------------------------------------------------------
# Wrapper: full VGGBlock forward.
# ---------------------------------------------------------------------------
def _bn_scale_shift(s_part, ss_part, count, gamma, beta):
    s = jnp.sum(s_part[:, 0, :], axis=0)
    ss = jnp.sum(ss_part[:, 0, :], axis=0)
    mean = s / count
    var = jnp.maximum(ss / count - mean * mean, 0.0)   # guard cancellation
    inv = gamma * jax.lax.rsqrt(var + EPS)
    return inv, beta - mean * inv


def vgg_block(x_nchw, p, *, compute_dtype=jnp.bfloat16):
    x = jnp.transpose(x_nchw, (0, 2, 3, 1)).astype(jnp.float32)   # NCHW->NHWC
    N, H, W, _ = x.shape
    Cmid, Cout = p["w1"].shape[-1], p["w2"].shape[-1]
    Cmid_p, Cout_p = _round_up(Cmid, LANE), _round_up(Cout, LANE)
    count = float(N * H * W)

    # Lane-pad the (tiny) parameter tensors once; activations are never padded
    # in HBM (layer 2's input already carries the padded channel axis).
    w1 = _pad_axis(p["w1"], -1, Cmid_p).astype(compute_dtype)
    b1 = _pad_axis(p["b1"], -1, Cmid_p).astype(jnp.float32)
    g1 = _pad_axis(p["gamma1"], -1, Cmid_p).astype(jnp.float32)
    be1 = _pad_axis(p["beta1"], -1, Cmid_p).astype(jnp.float32)
    w2 = _pad_axis(_pad_axis(p["w2"], 2, Cmid_p), -1, Cout_p).astype(compute_dtype)
    b2 = _pad_axis(p["b2"], -1, Cout_p).astype(jnp.float32)
    g2 = _pad_axis(p["gamma2"], -1, Cout_p).astype(jnp.float32)
    be2 = _pad_axis(p["beta2"], -1, Cout_p).astype(jnp.float32)

    # conv1 + BN1 statistics (raw conv output y1 stays f32 for the stats).
    y1, s1, ss1 = conv3x3_bn_stats(x, w1, b1, compute_dtype=compute_dtype)
    sc1, sh1 = _bn_scale_shift(s1, ss1, count, g1, be1)

    # conv2 with BN1-affine + ReLU fused into its input path + BN2 statistics.
    y2, s2, ss2 = conv3x3_bn_stats(y1, w2, b2, in_scale=sc1, in_shift=sh1,
                                   compute_dtype=compute_dtype)
    sc2, sh2 = _bn_scale_shift(s2, ss2, count, g2, be2)

    # Final BN2-affine + ReLU epilogue, then drop channel padding, back to NCHW.
    z2 = affine_relu(y2, sc2, sh2)
    return jnp.transpose(z2[..., :Cout], (0, 3, 1, 2))


# ---------------------------------------------------------------------------
# Pure-JAX reference (PyTorch training-mode BN semantics, f32).
# ---------------------------------------------------------------------------
def vgg_block_ref(x_nchw, p):
    x = jnp.transpose(x_nchw, (0, 2, 3, 1)).astype(jnp.float32)

    def conv(x, w, b):
        return jax.lax.conv_general_dilated(
            x, w, (1, 1), "SAME",
            dimension_numbers=("NHWC", "HWIO", "NHWC")) + b

    def bn_relu(y, gamma, beta):
        mean = jnp.mean(y, axis=(0, 1, 2))
        var = jnp.mean((y - mean) ** 2, axis=(0, 1, 2))
        return jnp.maximum((y - mean) * gamma / jnp.sqrt(var + EPS) + beta, 0.0)

    y = bn_relu(conv(x, p["w1"], p["b1"]), p["gamma1"], p["beta1"])
    y = bn_relu(conv(y, p["w2"], p["b2"]), p["gamma2"], p["beta2"])
    return jnp.transpose(y, (0, 3, 1, 2))


if __name__ == "__main__":
    key = jax.random.PRNGKey(0)
    N, Cin, H, W = 2, 4, 16, 16
    Cmid, Cout = 8, 16

    ks = jax.random.split(key, 9)
    x = jax.random.normal(ks[0], (N, Cin, H, W), jnp.float32)
    params = {
        "w1": 0.2 * jax.random.normal(ks[1], (3, 3, Cin, Cmid), jnp.float32),
        "b1": 0.1 * jax.random.normal(ks[2], (Cmid,), jnp.float32),
        "gamma1": 1.0 + 0.1 * jax.random.normal(ks[3], (Cmid,), jnp.float32),
        "beta1": 0.1 * jax.random.normal(ks[4], (Cmid,), jnp.float32),
        "w2": 0.2 * jax.random.normal(ks[5], (3, 3, Cmid, Cout), jnp.float32),
        "b2": 0.1 * jax.random.normal(ks[6], (Cout,), jnp.float32),
        "gamma2": 1.0 + 0.1 * jax.random.normal(ks[7], (Cout,), jnp.float32),
        "beta2": 0.1 * jax.random.normal(ks[8], (Cout,), jnp.float32),
    }

    ref = jax.block_until_ready(vgg_block_ref(x, params))

    # Exact-precision path (f32 MXU operands): tight check vs f32 reference.
    out_f32 = jax.block_until_ready(
        vgg_block(x, params, compute_dtype=jnp.float32))
    assert out_f32.shape == (N, Cout, H, W), out_f32.shape
    np.testing.assert_allclose(np.asarray(out_f32), np.asarray(ref),
                               rtol=1e-4, atol=1e-4)

    # Default fast path (bf16 MXU operands, f32 accumulation): looser tol.
    out_bf16 = jax.block_until_ready(vgg_block(x, params))
    np.testing.assert_allclose(np.asarray(out_bf16), np.asarray(ref),
                               rtol=5e-2, atol=5e-2)

    print("KERNEL_OK")
</pallas_src>

<mosaic_0001>
module attributes {stable_mosaic.version = 11 : i64} {
  func.func @kernel(%arg0: i32, %arg1: i32, %arg2: memref<1x16x16x4xf32, #tpu.memory_space<vmem>>, %arg3: memref<3x3x4x128xf32, #tpu.memory_space<vmem>>, %arg4: memref<1x128xf32, #tpu.memory_space<vmem>>, %arg5: memref<1x16x16x128xf32, #tpu.memory_space<vmem>>, %arg6: memref<1x1x128xf32, #tpu.memory_space<vmem>>, %arg7: memref<1x1x128xf32, #tpu.memory_space<vmem>>, %arg8: memref<18x18x4xf32, #tpu.memory_space<vmem>>, %arg9: memref<256x128xf32, #tpu.memory_space<vmem>>) attributes {dimension_semantics = [#tpu.dimension_semantics<parallel>, #tpu.dimension_semantics<parallel>], iteration_bounds = array<i64: 2, 1>, scalar_prefetch = 0 : i64, scratch_operands = 2 : i64, tpu.core_type = #tpu.core_type<tc>, window_params = [{transform_indices = @transform_0, window_bounds = array<i64: 1, 16, 16, 4>}, {transform_indices = @transform_1, window_bounds = array<i64: 3, 3, 4, 128>}, {transform_indices = @transform_2, window_bounds = array<i64: 1, 128>}, {transform_indices = @transform_3, window_bounds = array<i64: 1, 16, 16, 128>}, {transform_indices = @transform_4, window_bounds = array<i64: 1, 1, 128>}, {transform_indices = @transform_5, window_bounds = array<i64: 1, 1, 128>}]} {
    %c0 = arith.constant 0 : index
    %c0_0 = arith.constant 0 : index
    %c0_1 = arith.constant 0 : index
    %c0_2 = arith.constant 0 : index
    %0 = vector.load %arg2[%c0, %c0_0, %c0_1, %c0_2] : memref<1x16x16x4xf32, #tpu.memory_space<vmem>>, vector<1x16x16x4xf32>
    %1 = vector.shape_cast %0 : vector<1x16x16x4xf32> to vector<16x16x4xf32>
    %cst = arith.constant 0.000000e+00 : f32
    %2 = vector.broadcast %cst : f32 to vector<18x18x4xf32>
    %c0_3 = arith.constant 0 : index
    %c0_4 = arith.constant 0 : index
    %c0_5 = arith.constant 0 : index
    %3 = vector.load %arg8[%c0_3, %c0_4, %c0_5] : memref<18x18x4xf32, #tpu.memory_space<vmem>>, vector<18x18x4xf32>
    tpu.vector_store %arg8[%c0_3, %c0_4, %c0_5], %2 {strides = array<i32>} : memref<18x18x4xf32, #tpu.memory_space<vmem>>, vector<18x18x4xf32>,
    %c1 = arith.constant 1 : index
    %c1_6 = arith.constant 1 : index
    %c0_7 = arith.constant 0 : index
    %4 = vector.load %arg8[%c1, %c1_6, %c0_7] : memref<18x18x4xf32, #tpu.memory_space<vmem>>, vector<16x16x4xf32>
    tpu.vector_store %arg8[%c1, %c1_6, %c0_7], %1 {strides = array<i32>} : memref<18x18x4xf32, #tpu.memory_space<vmem>>, vector<16x16x4xf32>,
    %c0_8 = arith.constant 0 : index
    %c0_9 = arith.constant 0 : index
    %5 = vector.load %arg4[%c0_8, %c0_9] : memref<1x128xf32, #tpu.memory_space<vmem>>, vector<1x128xf32>
    %6 = vector.shape_cast %5 : vector<1x128xf32> to vector<1x128xf32>
    %7 = vector.broadcast %6 : vector<1x128xf32> to vector<256x128xf32>
    %c0_10 = arith.constant 0 : index
    %c0_11 = arith.constant 0 : index
    %8 = vector.load %arg9[%c0_10, %c0_11] : memref<256x128xf32, #tpu.memory_space<vmem>>, vector<256x128xf32>
    tpu.vector_store %arg9[%c0_10, %c0_11], %7 {strides = array<i32>} : memref<256x128xf32, #tpu.memory_space<vmem>>, vector<256x128xf32>,
    %c0_12 = arith.constant 0 : index
    %c0_13 = arith.constant 0 : index
    %c0_14 = arith.constant 0 : index
    %9 = vector.load %arg8[%c0_12, %c0_13, %c0_14] : memref<18x18x4xf32, #tpu.memory_space<vmem>>, vector<16x16x4xf32>
    %10 = vector.shape_cast %9 : vector<16x16x4xf32> to vector<256x4xf32>
    %c0_15 = arith.constant 0 : index
    %c0_16 = arith.constant 0 : index
    %11 = vector.load %arg9[%c0_15, %c0_16] : memref<256x128xf32, #tpu.memory_space<vmem>>, vector<256x128xf32>
    %c0_17 = arith.constant 0 : index
    %c0_18 = arith.constant 0 : index
    %c0_19 = arith.constant 0 : index
    %c0_20 = arith.constant 0 : index
    %12 = vector.load %arg3[%c0_17, %c0_18, %c0_19, %c0_20] : memref<3x3x4x128xf32, #tpu.memory_space<vmem>>, vector<1x1x4x128xf32>
    %13 = vector.shape_cast %12 : vector<1x1x4x128xf32> to vector<4x128xf32>
    %cst_21 = arith.constant dense<0.000000e+00> : vector<256x128xf32>
    %14 = tpu.matmul %10, %13, %cst_21 {dimension_numbers = #tpu.dot_dimension_numbers<[1], [0], [0], [1], [0, 0, 1, 1], [], []>} : vector<256x4xf32>, vector<4x128xf32>, vector<256x128xf32> -> vector<256x128xf32>
    %15 = arith.addf %11, %14 : vector<256x128xf32>
    %c0_22 = arith.constant 0 : index
    %c0_23 = arith.constant 0 : index
    %16 = vector.load %arg9[%c0_22, %c0_23] : memref<256x128xf32, #tpu.memory_space<vmem>>, vector<256x128xf32>
    tpu.vector_store %arg9[%c0_22, %c0_23], %15 {strides = array<i32>} : memref<256x128xf32, #tpu.memory_space<vmem>>, vector<256x128xf32>,
    %c0_24 = arith.constant 0 : index
    %c1_25 = arith.constant 1 : index
    %c0_26 = arith.constant 0 : index
    %17 = vector.load %arg8[%c0_24, %c1_25, %c0_26] : memref<18x18x4xf32, #tpu.memory_space<vmem>>, vector<16x16x4xf32>
    %18 = vector.shape_cast %17 : vector<16x16x4xf32> to vector<256x4xf32>
    %c0_27 = arith.constant 0 : index
    %c0_28 = arith.constant 0 : index
    %19 = vector.load %arg9[%c0_27, %c0_28] : memref<256x128xf32, #tpu.memory_space<vmem>>, vector<256x128xf32>
    %c0_29 = arith.constant 0 : index
    %c1_30 = arith.constant 1 : index
    %c0_31 = arith.constant 0 : index
    %c0_32 = arith.constant 0 : index
    %20 = vector.load %arg3[%c0_29, %c1_30, %c0_31, %c0_32] : memref<3x3x4x128xf32, #tpu.memory_space<vmem>>, vector<1x1x4x128xf32>
    %21 = vector.shape_cast %20 : vector<1x1x4x128xf32> to vector<4x128xf32>
    %cst_33 = arith.constant dense<0.000000e+00> : vector<256x128xf32>
    %22 = tpu.matmul %18, %21, %cst_33 {dimension_numbers = #tpu.dot_dimension_numbers<[1], [0], [0], [1], [0, 0, 1, 1], [], []>} : vector<256x4xf32>, vector<4x128xf32>, vector<256x128xf32> -> vector<256x128xf32>
    %23 = arith.addf %19, %22 : vector<256x128xf32>
    %c0_34 = arith.constant 0 : index
    %c0_35 = arith.constant 0 : index
    %24 = vector.load %arg9[%c0_34, %c0_35] : memref<256x128xf32, #tpu.memory_space<vmem>>, vector<256x128xf32>
    tpu.vector_store %arg9[%c0_34, %c0_35], %23 {strides = array<i32>} : memref<256x128xf32, #tpu.memory_space<vmem>>, vector<256x128xf32>,
    %c0_36 = arith.constant 0 : index
    %c2 = arith.constant 2 : index
    %c0_37 = arith.constant 0 : index
    %25 = vector.load %arg8[%c0_36, %c2, %c0_37] : memref<18x18x4xf32, #tpu.memory_space<vmem>>, vector<16x16x4xf32>
    %26 = vector.shape_cast %25 : vector<16x16x4xf32> to vector<256x4xf32>
    %c0_38 = arith.constant 0 : index
    %c0_39 = arith.constant 0 : index
    %27 = vector.load %arg9[%c0_38, %c0_39] : memref<256x128xf32, #tpu.memory_space<vmem>>, vector<256x128xf32>
    %c0_40 = arith.constant 0 : index
    %c2_41 = arith.constant 2 : index
    %c0_42 = arith.constant 0 : index
    %c0_43 = arith.constant 0 : index
    %28 = vector.load %arg3[%c0_40, %c2_41, %c0_42, %c0_43] : memref<3x3x4x128xf32, #tpu.memory_space<vmem>>, vector<1x1x4x128xf32>
    %29 = vector.shape_cast %28 : vector<1x1x4x128xf32> to vector<4x128xf32>
    %cst_44 = arith.constant dense<0.000000e+00> : vector<256x128xf32>
    %30 = tpu.matmul %26, %29, %cst_44 {dimension_numbers = #tpu.dot_dimension_numbers<[1], [0], [0], [1], [0, 0, 1, 1], [], []>} : vector<256x4xf32>, vector<4x128xf32>, vector<256x128xf32> -> vector<256x128xf32>
    %31 = arith.addf %27, %30 : vector<256x128xf32>
    %c0_45 = arith.constant 0 : index
    %c0_46 = arith.constant 0 : index
    %32 = vector.load %arg9[%c0_45, %c0_46] : memref<256x128xf32, #tpu.memory_space<vmem>>, vector<256x128xf32>
    tpu.vector_store %arg9[%c0_45, %c0_46], %31 {strides = array<i32>} : memref<256x128xf32, #tpu.memory_space<vmem>>, vector<256x128xf32>,
    %c1_47 = arith.constant 1 : index
    %c0_48 = arith.constant 0 : index
    %c0_49 = arith.constant 0 : index
    %33 = vector.load %arg8[%c1_47, %c0_48, %c0_49] : memref<18x18x4xf32, #tpu.memory_space<vmem>>, vector<16x16x4xf32>
    %34 = vector.shape_cast %33 : vector<16x16x4xf32> to vector<256x4xf32>
    %c0_50 = arith.constant 0 : index
    %c0_51 = arith.constant 0 : index
    %35 = vector.load %arg9[%c0_50, %c0_51] : memref<256x128xf32, #tpu.memory_space<vmem>>, vector<256x128xf32>
    %c1_52 = arith.constant 1 : index
    %c0_53 = arith.constant 0 : index
    %c0_54 = arith.constant 0 : index
    %c0_55 = arith.constant 0 : index
    %36 = vector.load %arg3[%c1_52, %c0_53, %c0_54, %c0_55] : memref<3x3x4x128xf32, #tpu.memory_space<vmem>>, vector<1x1x4x128xf32>
    %37 = vector.shape_cast %36 : vector<1x1x4x128xf32> to vector<4x128xf32>
    %cst_56 = arith.constant dense<0.000000e+00> : vector<256x128xf32>
    %38 = tpu.matmul %34, %37, %cst_56 {dimension_numbers = #tpu.dot_dimension_numbers<[1], [0], [0], [1], [0, 0, 1, 1], [], []>} : vector<256x4xf32>, vector<4x128xf32>, vector<256x128xf32> -> vector<256x128xf32>
    %39 = arith.addf %35, %38 : vector<256x128xf32>
    %c0_57 = arith.constant 0 : index
    %c0_58 = arith.constant 0 : index
    %40 = vector.load %arg9[%c0_57, %c0_58] : memref<256x128xf32, #tpu.memory_space<vmem>>, vector<256x128xf32>
    tpu.vector_store %arg9[%c0_57, %c0_58], %39 {strides = array<i32>} : memref<256x128xf32, #tpu.memory_space<vmem>>, vector<256x128xf32>,
    %c1_59 = arith.constant 1 : index
    %c1_60 = arith.constant 1 : index
    %c0_61 = arith.constant 0 : index
    %41 = vector.load %arg8[%c1_59, %c1_60, %c0_61] : memref<18x18x4xf32, #tpu.memory_space<vmem>>, vector<16x16x4xf32>
    %42 = vector.shape_cast %41 : vector<16x16x4xf32> to vector<256x4xf32>
    %c0_62 = arith.constant 0 : index
    %c0_63 = arith.constant 0 : index
    %43 = vector.load %arg9[%c0_62, %c0_63] : memref<256x128xf32, #tpu.memory_space<vmem>>, vector<256x128xf32>
    %c1_64 = arith.constant 1 : index
    %c1_65 = arith.constant 1 : index
    %c0_66 = arith.constant 0 : index
    %c0_67 = arith.constant 0 : index
    %44 = vector.load %arg3[%c1_64, %c1_65, %c0_66, %c0_67] : memref<3x3x4x128xf32, #tpu.memory_space<vmem>>, vector<1x1x4x128xf32>
    %45 = vector.shape_cast %44 : vector<1x1x4x128xf32> to vector<4x128xf32>
    %cst_68 = arith.constant dense<0.000000e+00> : vector<256x128xf32>
    %46 = tpu.matmul %42, %45, %cst_68 {dimension_numbers = #tpu.dot_dimension_numbers<[1], [0], [0], [1], [0, 0, 1, 1], [], []>} : vector<256x4xf32>, vector<4x128xf32>, vector<256x128xf32> -> vector<256x128xf32>
    %47 = arith.addf %43, %46 : vector<256x128xf32>
    %c0_69 = arith.constant 0 : index
    %c0_70 = arith.constant 0 : index
    %48 = vector.load %arg9[%c0_69, %c0_70] : memref<256x128xf32, #tpu.memory_space<vmem>>, vector<256x128xf32>
    tpu.vector_store %arg9[%c0_69, %c0_70], %47 {strides = array<i32>} : memref<256x128xf32, #tpu.memory_space<vmem>>, vector<256x128xf32>,
    %c1_71 = arith.constant 1 : index
    %c2_72 = arith.constant 2 : index
    %c0_73 = arith.constant 0 : index
    %49 = vector.load %arg8[%c1_71, %c2_72, %c0_73] : memref<18x18x4xf32, #tpu.memory_space<vmem>>, vector<16x16x4xf32>
    %50 = vector.shape_cast %49 : vector<16x16x4xf32> to vector<256x4xf32>
    %c0_74 = arith.constant 0 : index
    %c0_75 = arith.constant 0 : index
    %51 = vector.load %arg9[%c0_74, %c0_75] : memref<256x128xf32, #tpu.memory_space<vmem>>, vector<256x128xf32>
    %c1_76 = arith.constant 1 : index
    %c2_77 = arith.constant 2 : index
    %c0_78 = arith.constant 0 : index
    %c0_79 = arith.constant 0 : index
    %52 = vector.load %arg3[%c1_76, %c2_77, %c0_78, %c0_79] : memref<3x3x4x128xf32, #tpu.memory_space<vmem>>, vector<1x1x4x128xf32>
    %53 = vector.shape_cast %52 : vector<1x1x4x128xf32> to vector<4x128xf32>
    %cst_80 = arith.constant dense<0.000000e+00> : vector<256x128xf32>
    %54 = tpu.matmul %50, %53, %cst_80 {dimension_numbers = #tpu.dot_dimension_numbers<[1], [0], [0], [1], [0, 0, 1, 1], [], []>} : vector<256x4xf32>, vector<4x128xf32>, vector<256x128xf32> -> vector<256x128xf32>
    %55 = arith.addf %51, %54 : vector<256x128xf32>
    %c0_81 = arith.constant 0 : index
    %c0_82 = arith.constant 0 : index
    %56 = vector.load %arg9[%c0_81, %c0_82] : memref<256x128xf32, #tpu.memory_space<vmem>>, vector<256x128xf32>
    tpu.vector_store %arg9[%c0_81, %c0_82], %55 {strides = array<i32>} : memref<256x128xf32, #tpu.memory_space<vmem>>, vector<256x128xf32>,
    %c2_83 = arith.constant 2 : index
    %c0_84 = arith.constant 0 : index
    %c0_85 = arith.constant 0 : index
    %57 = vector.load %arg8[%c2_83, %c0_84, %c0_85] : memref<18x18x4xf32, #tpu.memory_space<vmem>>, vector<16x16x4xf32>
    %58 = vector.shape_cast %57 : vector<16x16x4xf32> to vector<256x4xf32>
    %c0_86 = arith.constant 0 : index
    %c0_87 = arith.constant 0 : index
    %59 = vector.load %arg9[%c0_86, %c0_87] : memref<256x128xf32, #tpu.memory_space<vmem>>, vector<256x128xf32>
    %c2_88 = arith.constant 2 : index
    %c0_89 = arith.constant 0 : index
    %c0_90 = arith.constant 0 : index
    %c0_91 = arith.constant 0 : index
    %60 = vector.load %arg3[%c2_88, %c0_89, %c0_90, %c0_91] : memref<3x3x4x128xf32, #tpu.memory_space<vmem>>, vector<1x1x4x128xf32>
    %61 = vector.shape_cast %60 : vector<1x1x4x128xf32> to vector<4x128xf32>
    %cst_92 = arith.constant dense<0.000000e+00> : vector<256x128xf32>
    %62 = tpu.matmul %58, %61, %cst_92 {dimension_numbers = #tpu.dot_dimension_numbers<[1], [0], [0], [1], [0, 0, 1, 1], [], []>} : vector<256x4xf32>, vector<4x128xf32>, vector<256x128xf32> -> vector<256x128xf32>
    %63 = arith.addf %59, %62 : vector<256x128xf32>
    %c0_93 = arith.constant 0 : index
    %c0_94 = arith.constant 0 : index
    %64 = vector.load %arg9[%c0_93, %c0_94] : memref<256x128xf32, #tpu.memory_space<vmem>>, vector<256x128xf32>
    tpu.vector_store %arg9[%c0_93, %c0_94], %63 {strides = array<i32>} : memref<256x128xf32, #tpu.memory_space<vmem>>, vector<256x128xf32>,
    %c2_95 = arith.constant 2 : index
    %c1_96 = arith.constant 1 : index
    %c0_97 = arith.constant 0 : index
    %65 = vector.load %arg8[%c2_95, %c1_96, %c0_97] : memref<18x18x4xf32, #tpu.memory_space<vmem>>, vector<16x16x4xf32>
    %66 = vector.shape_cast %65 : vector<16x16x4xf32> to vector<256x4xf32>
    %c0_98 = arith.constant 0 : index
    %c0_99 = arith.constant 0 : index
    %67 = vector.load %arg9[%c0_98, %c0_99] : memref<256x128xf32, #tpu.memory_space<vmem>>, vector<256x128xf32>
    %c2_100 = arith.constant 2 : index
    %c1_101 = arith.constant 1 : index
    %c0_102 = arith.constant 0 : index
    %c0_103 = arith.constant 0 : index
    %68 = vector.load %arg3[%c2_100, %c1_101, %c0_102, %c0_103] : memref<3x3x4x128xf32, #tpu.memory_space<vmem>>, vector<1x1x4x128xf32>
    %69 = vector.shape_cast %68 : vector<1x1x4x128xf32> to vector<4x128xf32>
    %cst_104 = arith.constant dense<0.000000e+00> : vector<256x128xf32>
    %70 = tpu.matmul %66, %69, %cst_104 {dimension_numbers = #tpu.dot_dimension_numbers<[1], [0], [0], [1], [0, 0, 1, 1], [], []>} : vector<256x4xf32>, vector<4x128xf32>, vector<256x128xf32> -> vector<256x128xf32>
    %71 = arith.addf %67, %70 : vector<256x128xf32>
    %c0_105 = arith.constant 0 : index
    %c0_106 = arith.constant 0 : index
    %72 = vector.load %arg9[%c0_105, %c0_106] : memref<256x128xf32, #tpu.memory_space<vmem>>, vector<256x128xf32>
    tpu.vector_store %arg9[%c0_105, %c0_106], %71 {strides = array<i32>} : memref<256x128xf32, #tpu.memory_space<vmem>>, vector<256x128xf32>,
    %c2_107 = arith.constant 2 : index
    %c2_108 = arith.constant 2 : index
    %c0_109 = arith.constant 0 : index
    %73 = vector.load %arg8[%c2_107, %c2_108, %c0_109] : memref<18x18x4xf32, #tpu.memory_space<vmem>>, vector<16x16x4xf32>
    %74 = vector.shape_cast %73 : vector<16x16x4xf32> to vector<256x4xf32>
    %c0_110 = arith.constant 0 : index
    %c0_111 = arith.constant 0 : index
    %75 = vector.load %arg9[%c0_110, %c0_111] : memref<256x128xf32, #tpu.memory_space<vmem>>, vector<256x128xf32>
    %c2_112 = arith.constant 2 : index
    %c2_113 = arith.constant 2 : index
    %c0_114 = arith.constant 0 : index
    %c0_115 = arith.constant 0 : index
    %76 = vector.load %arg3[%c2_112, %c2_113, %c0_114, %c0_115] : memref<3x3x4x128xf32, #tpu.memory_space<vmem>>, vector<1x1x4x128xf32>
    %77 = vector.shape_cast %76 : vector<1x1x4x128xf32> to vector<4x128xf32>
    %cst_116 = arith.constant dense<0.000000e+00> : vector<256x128xf32>
    %78 = tpu.matmul %74, %77, %cst_116 {dimension_numbers = #tpu.dot_dimension_numbers<[1], [0], [0], [1], [0, 0, 1, 1], [], []>} : vector<256x4xf32>, vector<4x128xf32>, vector<256x128xf32> -> vector<256x128xf32>
    %79 = arith.addf %75, %78 : vector<256x128xf32>
    %c0_117 = arith.constant 0 : index
    %c0_118 = arith.constant 0 : index
    %80 = vector.load %arg9[%c0_117, %c0_118] : memref<256x128xf32, #tpu.memory_space<vmem>>, vector<256x128xf32>
    tpu.vector_store %arg9[%c0_117, %c0_118], %79 {strides = array<i32>} : memref<256x128xf32, #tpu.memory_space<vmem>>, vector<256x128xf32>,
    %c0_119 = arith.constant 0 : index
    %c0_120 = arith.constant 0 : index
    %81 = vector.load %arg9[%c0_119, %c0_120] : memref<256x128xf32, #tpu.memory_space<vmem>>, vector<256x128xf32>
    %82 = vector.shape_cast %81 : vector<256x128xf32> to vector<1x16x16x128xf32>
    %c0_121 = arith.constant 0 : index
    %c0_122 = arith.constant 0 : index
    %c0_123 = arith.constant 0 : index
    %c0_124 = arith.constant 0 : index
    %83 = vector.load %arg5[%c0_121, %c0_122, %c0_123, %c0_124] : memref<1x16x16x128xf32, #tpu.memory_space<vmem>>, vector<1x16x16x128xf32>
    tpu.vector_store %arg5[%c0_121, %c0_122, %c0_123, %c0_124], %82 {strides = array<i32>} : memref<1x16x16x128xf32, #tpu.memory_space<vmem>>, vector<1x16x16x128xf32>,
    %cst_125 = arith.constant dense<0.000000e+00> : vector<128xf32>
    %84 = vector.multi_reduction <add>, %81, %cst_125 [0] : vector<256x128xf32> to vector<128xf32>
    %85 = vector.shape_cast %84 : vector<128xf32> to vector<1x128xf32>
    %86 = vector.shape_cast %85 : vector<1x128xf32> to vector<1x1x128xf32>
    %c0_126 = arith.constant 0 : index
    %c0_127 = arith.constant 0 : index
    %c0_128 = arith.constant 0 : index
    %87 = vector.load %arg6[%c0_126, %c0_127, %c0_128] : memref<1x1x128xf32, #tpu.memory_space<vmem>>, vector<1x1x128xf32>
    tpu.vector_store %arg6[%c0_126, %c0_127, %c0_128], %86 {strides = array<i32>} : memref<1x1x128xf32, #tpu.memory_space<vmem>>, vector<1x1x128xf32>,
    %88 = arith.mulf %81, %81 : vector<256x128xf32>
    %cst_129 = arith.constant dense<0.000000e+00> : vector<128xf32>
    %89 = vector.multi_reduction <add>, %88, %cst_129 [0] : vector<256x128xf32> to vector<128xf32>
    %90 = vector.shape_cast %89 : vector<128xf32> to vector<1x128xf32>
    %91 = vector.shape_cast %90 : vector<1x128xf32> to vector<1x1x128xf32>
    %c0_130 = arith.constant 0 : index
    %c0_131 = arith.constant 0 : index
    %c0_132 = arith.constant 0 : index
    %92 = vector.load %arg7[%c0_130, %c0_131, %c0_132] : memref<1x1x128xf32, #tpu.memory_space<vmem>>, vector<1x1x128xf32>
    tpu.vector_store %arg7[%c0_130, %c0_131, %c0_132], %91 {strides = array<i32>} : memref<1x1x128xf32, #tpu.memory_space<vmem>>, vector<1x1x128xf32>,
    return
  }
  func.func @transform_0(%arg0: i32, %arg1: i32) -> (i32, i32, i32, i32) {
    %c0_i32 = arith.constant 0 : i32
    %c0_i32_0 = arith.constant 0 : i32
    %c0_i32_1 = arith.constant 0 : i32
    %c0_i32_2 = arith.constant 0 : i32
    return %arg0, %c0_i32, %c0_i32_0, %c0_i32_1 : i32, i32, i32, i32
  }
  func.func @transform_1(%arg0: i32, %arg1: i32) -> (i32, i32, i32, i32) {
    %c0_i32 = arith.constant 0 : i32
    %c0_i32_0 = arith.constant 0 : i32
    %c0_i32_1 = arith.constant 0 : i32
    %c0_i32_2 = arith.constant 0 : i32
    return %c0_i32, %c0_i32_0, %c0_i32_1, %arg1 : i32, i32, i32, i32
  }
  func.func @transform_2(%arg0: i32, %arg1: i32) -> (i32, i32) {
    %c0_i32 = arith.constant 0 : i32
    %c0_i32_0 = arith.constant 0 : i32
    return %c0_i32, %arg1 : i32, i32
  }
  func.func @transform_3(%arg0: i32, %arg1: i32) -> (i32, i32, i32, i32) {
    %c0_i32 = arith.constant 0 : i32
    %c0_i32_0 = arith.constant 0 : i32
    %c0_i32_1 = arith.constant 0 : i32
    return %arg0, %c0_i32, %c0_i32_0, %arg1 : i32, i32, i32, i32
  }
  func.func @transform_4(%arg0: i32, %arg1: i32) -> (i32, i32, i32) {
    %c0_i32 = arith.constant 0 : i32
    %c0_i32_0 = arith.constant 0 : i32
    return %arg0, %c0_i32, %arg1 : i32, i32, i32
  }
  func.func @transform_5(%arg0: i32, %arg1: i32) -> (i32, i32, i32) {
    %c0_i32 = arith.constant 0 : i32
    %c0_i32_0 = arith.constant 0 : i32
    return %arg0, %c0_i32, %arg1 : i32, i32, i32
  }
}

</mosaic_0001>

<bundles_post_ra>
// kernel: tpu_custom_call.1
= control target key start
LH: loop header
LB: loop body
LE: loop exit
PB: predicated region body
PF: predicated region fallthrough
CT: control target
= control target key end

     0   :  { %11 = vsyncpa [#allocation5], 0  ;;  %s7892_s0 = inlined_call_operand.vmem [shape: f32[2,16,16,4], index: 0, kind: input, shape index: {}]   ;;  %s7893_s1 = inlined_call_operand.vmem [shape: f32[3,3,4,128], index: 1, kind: input, shape index: {}]   ;;  %s7894_s2 = inlined_call_operand.vmem [shape: f32[1,128], index: 2, kind: input, shape index: {}]   ;;  %s7895_s3 = inlined_call_operand.hbm [shape: f32[2,16,16,128], index: 3, kind: output, shape index: {0}]   ;;  %s7896_s4 = inlined_call_operand.hbm [shape: f32[2,1,128], index: 4, kind: output, shape index: {1}]   ;;  %s7897_s5 = inlined_call_operand.hbm [shape: f32[2,1,128], index: 5, kind: output, shape index: {2}]  }
   0x1   :  { %13 = vsyncpa [#allocation5 + $0x1], 0 }
   0x2   :  { %14 = vsyncpa [#allocation7], 0 }
   0x3   :  { %16 = vsyncpa [#allocation7 + $0x1], 0  ;;  %s6224_s18 = smov 0   ;;  %s6226_s19 = smov 0  }
   0x4   :  { %s6228_s20 = smov 0   ;;  %s6230_s21 = smov 0  }
   0x5   :  { %s6232_s22 = smov 0   ;;  %s6234_s23 = smov 0  }
   0x6 LB: > { %s4912_s24 = sadd.s32 4294967295, %s6186_s23   ;;  %s7947_s25 = sadd.s32 4294967294, %s6186_s23   ;;  %s6186_s23 = sphi %s6234_s23, %s22_s23   ;;  %s6182_s22 = sphi %s6232_s22, %s8127_s22   ;;  %s6178_s21 = sphi %s6230_s21, %s8126_s21   ;;  %s6174_s20 = sphi %s6228_s20, %s8125_s20   ;;  %s6170_s19 = sphi %s6226_s19, %s8124_s19   ;;  %s6166_s18 = sphi %s6224_s18, %s8123_s18  }
   0x7   : > { %s34_s26 = sadd.s32 1, %s6182_s22  ;;  %s121_s27 = sadd.s32 1, %s6174_s20 }
   0x8   : > { %p36_p0 = scmp.ge.s32.totalorder %s34_s26, 2  ;;  %p131_p1 = scmp.ne.s32.totalorder %s6174_s20, %s6170_s19 }
   0x9   : > { %p132_p2 = scmp.eq.s32.totalorder %s4912_s24, 1  ;;  %p137_p3 = scmp.ne.s32.totalorder %s6170_s19, %s6166_s18 }
   0xa   : > { %s8129_s26 = smov (%p36_p0, %s34_s26), 0  ;;  %p138_p5 = scmp.eq.s32.totalorder %s7947_s25, 1 }
   0xb   : > { %p6266_p4 = por %p132_p2, %p131_p1  ;;  %s116_s29 = ssub.s32 %s6182_s22, %s8129_s26 }
   0xc   : > { %p4918_p6 = scmp.ge.s32.totalorder %s6186_s23, 1  ;;  %p119_p7 = scmp.eq.s32.totalorder %s116_s29, 0 }
   0xd   : > { %p6275_p8 = por %p138_p5, %p137_p3  ;;  %p233_p9 = scmp.lt.s32.totalorder %s6186_s23, 3 }
   0xe   : > { %s6281_s6 = scalar_select %p119_p7, %s6174_s20, %s121_s27  }
   0xf   : > { %p234_p10 = pnand %p4918_p6, %p233_p9 }
  0x11   : > { %237 = sbr.rel (%p234_p10) target bundleno = 605 (0x25d), region = 32 }
  0x16   : > { %v512_v0 = vld [vmem:[%s7893_s1] sm:$0xf]  ;;  %vm609_vm0 = vcmask 1043456   ;;  %vm320_vm1 = vcmask 31744   ;;  %p276_p11 = scmp.lt.s32.totalorder %s6178_s21, 1  ;;  %v6188_v1 = vmov 0.0  }
  0x17   : > { %5984 = vmatprep.subr.msk.mxu1 %vm609_vm0, %v512_v0  ;;  %5534 = vmatprep.subr.msk.mxu0 %vm609_vm0, %v512_v0  ;;  %321 = vst.msk [vmem:[#allocation2] sm:$0xff] %vm320_vm1, %v6188_v1  ;;  %322 = vst.msk [vmem:[#allocation2 + $0x8] sm:$0xff] %vm320_vm1, %v6188_v1  ;;  %v6328_v2 = vld [vmem:[%s7893_s1 + $0x4] sm:$0xf]  ;;  %vm323_vm2 = vcmask 25600   ;;  %s7634_s29 = sand.u32 1, %s6170_s19  }
  0x18   : > { %325 = vst.msk [vmem:[#allocation2 + $0x18] sm:$0xff] %vm320_vm1, %v6188_v1  ;;  %326 = vst.msk [vmem:[#allocation2 + $0x20] sm:$0xff] %vm320_vm1, %v6188_v1  ;;  %v4990_v3 = vld [vmem:[%s7893_s1 + $0x8] sm:$0xf]  ;;  %5985 = vmatpush3.msk.msra.mxu1 %vm609_vm0, %v512_v0  ;;  %5535 = vmatpush3.msk.msra.mxu0 %vm609_vm0, %v512_v0  ;;  %s277_s13 = scalar_select %p276_p11, %s6178_s21, 1 }
  0x19   : > { %328 = vst.msk [vmem:[#allocation2 + $0x30] sm:$0xff] %vm320_vm1, %v6188_v1  ;;  %329 = vst.msk [vmem:[#allocation2 + $0x38] sm:$0xff] %vm320_vm1, %v6188_v1  ;;  %5584 = vmatprep.subr.msk.mxu1 %vm609_vm0, %v6328_v2  ;;  %5634 = vmatprep.subr.msk.mxu0 %vm609_vm0, %v4990_v3  ;;  %v6376_v10 = vld [vmem:[%s7893_s1 + $0x10] sm:$0xf]  ;;  %v6435_v34 = vld [vmem:[%s7893_s1 + $0xc] sm:$0xf] }
  0x1a   : > { %331 = vst.msk [vmem:[#allocation2 + $0x48] sm:$0xff] %vm320_vm1, %v6188_v1  ;;  %332 = vst.msk [vmem:[#allocation2 + $0x50] sm:$0xff] %vm320_vm1, %v6188_v1  ;;  %s5235_s14 = sshll.u32 %s277_s13, 8  ;;  %s4919_s7 = sshll.u32 %s7634_s29, 8 }
  0x1b   : > { %334 = vst.msk [vmem:[#allocation2 + $0x60] sm:$0xff] %vm320_vm1, %v6188_v1  ;;  %335 = vst.msk [vmem:[#allocation2 + $0x68] sm:$0xff] %vm320_vm1, %v6188_v1  ;;  %s6362_s17 = scalar_lea.vmem %s7892_s0, %s5235_s14  ;;  %s7652_s8 = scalar_lea.vmem [#allocation4], %s4919_s7 }
  0x1c   : > { %337 = vst.msk [vmem:[#allocation2 + $0x78] sm:$0xff] %vm320_vm1, %v6188_v1  ;;  %338 = vst.msk [vmem:[#allocation2 + $0x80] sm:$0xff] %vm320_vm1, %v6188_v1  ;;  %v302_v4 = vld [vmem:[%s6362_s17 + $0x70] sm:$0xff]  ;;  %v303_v5 = vld [vmem:[%s6362_s17 + $0x78] sm:$0xff]  ;;  %s5236_s9 = sshll.u32 %s6178_s21, 12  ;;  %s4730_s10 = sshll.u32 %s7652_s8, 4  ;;  %s7771_s10 = int_to_ptr.vmem [resolvable:$true] %s4730_s10 }
  0x1d   : > { %340 = vst.msk [vmem:[#allocation2 + $0x90] sm:$0xff] %vm320_vm1, %v6188_v1  ;;  %341 = vst.msk [vmem:[#allocation2 + $0x98] sm:$0xff] %vm320_vm1, %v6188_v1  ;;  %v288_v6 = vld [vmem:[%s6362_s17] sm:$0xff]  ;;  %v289_v8 = vld [vmem:[%s6362_s17 + $0x8] sm:$0xff]  ;;  %s7769_s13 = scalar_lea.hbm %s7895_s3, %s5236_s9  ;;  %s4708_s14 = scalar_lea.sflag [#allocation5], %s7634_s29 }
  0x1e   : > { %343 = vst.msk [vmem:[#allocation2 + $0xa8] sm:$0xff] %vm320_vm1, %v6188_v1  ;;  %344 = vst.msk [vmem:[#allocation2 + $0xb0] sm:$0xff] %vm320_vm1, %v6188_v1  ;;  %v304_v7 = vld [vmem:[%s6362_s17 + $0x80] sm:$0xff]  ;;  %v305_v9 = vld [vmem:[%s6362_s17 + $0x88] sm:$0xff]  ;;  %s6054_s15 = scalar_lea.vmem %s7771_s10, 4096  ;;  %s6189_s16 = smov [#allocation4]  }
  0x1f   : > { %346 = vst.msk [vmem:[#allocation2 + $0xc0] sm:$0xff] %vm320_vm1, %v6188_v1  ;;  %347 = vst.msk [vmem:[#allocation2 + $0xc8] sm:$0xff] %vm320_vm1, %v6188_v1  ;;  %v448_v11 = vld [vmem:[#allocation2] sm:$0xff]  ;;  %v449_v12 = vld [vmem:[#allocation2 + $0x8] sm:$0xff]  ;;  %p6055_p12 = scmp.ne.s32.totalorder %s7771_s10, %s6054_s15 }
  0x20   : > { %349 = vst.msk [vmem:[#allocation2 + $0xd8] sm:$0xff] %vm320_vm1, %v6188_v1  ;;  %350 = vst.msk [vmem:[#allocation2 + $0xe0] sm:$0xff] %vm320_vm1, %v6188_v1  ;;  %v290_v13 = vld [vmem:[%s6362_s17 + $0x10] sm:$0xff]  ;;  %5536 = vmatprep.mubr.msk.f32.mxu0 %vm320_vm1, %v448_v11  ;;  %v291_v15 = vld [vmem:[%s6362_s17 + $0x18] sm:$0xff] }
  0x21   : > { %352 = vst.msk [vmem:[#allocation2 + $0xf0] sm:$0xff] %vm320_vm1, %v6188_v1  ;;  %353 = vst.msk [vmem:[#allocation2 + $0xf8] sm:$0xff] %vm320_vm1, %v6188_v1  ;;  %v306_v14 = vld [vmem:[%s6362_s17 + $0x90] sm:$0xff]  ;;  %v307_v16 = vld [vmem:[%s6362_s17 + $0x98] sm:$0xff]  ;;  %5537 = vmatmul.mubr.msk.f32.vlgmr.msra.gmra.mxu0 %vm320_vm1, %v449_v12  ;;  %p6056_p13 = pnand %p6055_p12, %p6266_p4 }
  0x22   : > { %355 = vst.msk [vmem:[#allocation2 + $0x108] sm:$0xff] %vm320_vm1, %v6188_v1  ;;  %356 = vst.msk [vmem:[#allocation2 + $0x110] sm:$0xff] %vm320_vm1, %v6188_v1  ;;  %v292_v17 = vld [vmem:[%s6362_s17 + $0x20] sm:$0xff]  ;;  %v293_v19 = vld [vmem:[%s6362_s17 + $0x28] sm:$0xff]  ;;  %5635 = vmatpush3.msk.msra.mxu0 %vm609_vm0, %v4990_v3 }
  0x23   : > { %358 = vst.msk [vmem:[#allocation2 + $0x120] sm:$0xff] %vm320_vm1, %v6188_v1  ;;  %359 = vst.msk [vmem:[#allocation2 + $0x128] sm:$0xff] %vm320_vm1, %v6188_v1  ;;  %v308_v18 = vld [vmem:[%s6362_s17 + $0xa0] sm:$0xff]  ;;  %v309_v20 = vld [vmem:[%s6362_s17 + $0xa8] sm:$0xff]  ;;  %5734 = vmatprep.subr.msk.mxu0 %vm609_vm0, %v6376_v10  ;;  %p6057_p0 = pneg %p6056_p13 }
  0x24   : > { %361 = vst.msk [vmem:[#allocation2 + $0x138] sm:$0xff] %vm320_vm1, %v6188_v1  ;;  %362 = vst.msk [vmem:[#allocation2 + $0x140] sm:$0xff] %vm320_vm1, %v6188_v1  ;;  %v294_v21 = vld [vmem:[%s6362_s17 + $0x30] sm:$0xff]  ;;  %v295_v23 = vld [vmem:[%s6362_s17 + $0x38] sm:$0xff] }
  0x25   : > { %364 = vst.msk [vmem:[#allocation2 + $0x150] sm:$0xff] %vm320_vm1, %v6188_v1  ;;  %365 = vst.msk [vmem:[#allocation2 + $0x158] sm:$0xff] %vm320_vm1, %v6188_v1  ;;  %v310_v22 = vld [vmem:[%s6362_s17 + $0xb0] sm:$0xff]  ;;  %v311_v24 = vld [vmem:[%s6362_s17 + $0xb8] sm:$0xff] }
  0x26   : > { %367 = vst.msk [vmem:[#allocation2 + $0x168] sm:$0xff] %vm320_vm1, %v6188_v1  ;;  %368 = vst.msk [vmem:[#allocation2 + $0x170] sm:$0xff] %vm320_vm1, %v6188_v1  ;;  %v296_v25 = vld [vmem:[%s6362_s17 + $0x40] sm:$0xff]  ;;  %v297_v27 = vld [vmem:[%s6362_s17 + $0x48] sm:$0xff] }
  0x27   : > { %370 = vst.msk [vmem:[#allocation2 + $0x180] sm:$0xff] %vm320_vm1, %v6188_v1  ;;  %371 = vst.msk [vmem:[#allocation2 + $0x188] sm:$0xff] %vm320_vm1, %v6188_v1  ;;  %v312_v26 = vld [vmem:[%s6362_s17 + $0xc0] sm:$0xff]  ;;  %v313_v28 = vld [vmem:[%s6362_s17 + $0xc8] sm:$0xff] }
  0x28   : > { %373 = vst.msk [vmem:[#allocation2 + $0x198] sm:$0xff] %vm320_vm1, %v6188_v1  ;;  %374 = vst.msk [vmem:[#allocation2 + $0x1a0] sm:$0xff] %vm320_vm1, %v6188_v1  ;;  %v298_v36 = vld [vmem:[%s6362_s17 + $0x50] sm:$0xff]  ;;  %v299_v46 = vld [vmem:[%s6362_s17 + $0x58] sm:$0xff] }
  0x29   : > { %348 = vst.msk [vmem:[#allocation2 + $0xd0] sm:$0x3] %vm323_vm2, %v6188_v1  ;;  %324 = vst.msk [vmem:[#allocation2 + $0x10] sm:$0x3] %vm323_vm2, %v6188_v1  ;;  %v314_v37 = vld [vmem:[%s6362_s17 + $0xd0] sm:$0xff]  ;;  %v315_v47 = vld [vmem:[%s6362_s17 + $0xd8] sm:$0xff] }
  0x2a   : > { %327 = vst.msk [vmem:[#allocation2 + $0x28] sm:$0x3] %vm323_vm2, %v6188_v1  ;;  %330 = vst.msk [vmem:[#allocation2 + $0x40] sm:$0x3] %vm323_vm2, %v6188_v1  ;;  %v300_v48 = vld [vmem:[%s6362_s17 + $0x60] sm:$0xff]  ;;  %v301_v50 = vld [vmem:[%s6362_s17 + $0x68] sm:$0xff] }
  0x2b   : > { %333 = vst.msk [vmem:[#allocation2 + $0x58] sm:$0x3] %vm323_vm2, %v6188_v1  ;;  %336 = vst.msk [vmem:[#allocation2 + $0x70] sm:$0x3] %vm323_vm2, %v6188_v1  ;;  %v316_v49 = vld [vmem:[%s6362_s17 + $0xe0] sm:$0xff]  ;;  %v317_v51 = vld [vmem:[%s6362_s17 + $0xe8] sm:$0xff] }
  0x2c   : > { %339 = vst.msk [vmem:[#allocation2 + $0x88] sm:$0x3] %vm323_vm2, %v6188_v1  ;;  %342 = vst.msk [vmem:[#allocation2 + $0xa0] sm:$0x3] %vm323_vm2, %v6188_v1  ;;  %v1356_v3 = vld [vmem:[#allocation2 + $0x2] sm:$0xff] }
  0x2d   : > { %345 = vst.msk [vmem:[#allocation2 + $0xb8] sm:$0x3] %vm323_vm2, %v6188_v1  ;;  %351 = vst.msk [vmem:[#allocation2 + $0xe8] sm:$0x3] %vm323_vm2, %v6188_v1 }
  0x2e   : > { %354 = vst.msk [vmem:[#allocation2 + $0x100] sm:$0x3] %vm323_vm2, %v6188_v1  ;;  %357 = vst.msk [vmem:[#allocation2 + $0x118] sm:$0x3] %vm323_vm2, %v6188_v1 }
  0x2f   : > { %360 = vst.msk [vmem:[#allocation2 + $0x130] sm:$0x3] %vm323_vm2, %v6188_v1  ;;  %363 = vst.msk [vmem:[#allocation2 + $0x148] sm:$0x3] %vm323_vm2, %v6188_v1 }
  0x30   : > { %366 = vst.msk [vmem:[#allocation2 + $0x160] sm:$0x3] %vm323_vm2, %v6188_v1  ;;  %369 = vst.msk [vmem:[#allocation2 + $0x178] sm:$0x3] %vm323_vm2, %v6188_v1 }
  0x31   : > { %372 = vst.msk [vmem:[#allocation2 + $0x190] sm:$0x3] %vm323_vm2, %v6188_v1  ;;  %375 = vst.msk [vmem:[#allocation2 + $0x1a8] sm:$0x3] %vm323_vm2, %v6188_v1 }
  0x32   : > { %391 = vst.msk [vmem:[#allocation2 + $0xc1] sm:$0xff] %vm320_vm1, %v302_v4  ;;  %392 = vst.msk [vmem:[#allocation2 + $0xc9] sm:$0xff] %vm320_vm1, %v303_v5  ;;  %v1357_v5 = vld [vmem:[#allocation2 + $0xa] sm:$0xff] }
  0x33   : > { %377 = vst.msk [vmem:[#allocation2 + $0x19] sm:$0xff] %vm320_vm1, %v288_v6  ;;  %393 = vst.msk [vmem:[#allocation2 + $0xd9] sm:$0xff] %vm320_vm1, %v304_v7  ;;  %v902_v6 = vld [vmem:[#allocation2 + $0x1] sm:$0xff] }
  0x34   : > { %378 = vst.msk [vmem:[#allocation2 + $0x21] sm:$0xff] %vm320_vm1, %v289_v8  ;;  %394 = vst.msk [vmem:[#allocation2 + $0xe1] sm:$0xff] %vm320_vm1, %v305_v9  ;;  %v6567_v8 = vld [vmem:[%s7893_s1 + $0x18] sm:$0xf]  ;;  %v903_v9 = vld [vmem:[#allocation2 + $0x9] sm:$0xff] }
  0x35   : > { %379 = vst.msk [vmem:[#allocation2 + $0x31] sm:$0xff] %vm320_vm1, %v290_v13  ;;  %395 = vst.msk [vmem:[#allocation2 + $0xf1] sm:$0xff] %vm320_vm1, %v306_v14  ;;  %v6588_v14 = vld [vmem:[%s7893_s1 + $0x14] sm:$0xf] }
  0x36   : > { %380 = vst.msk [vmem:[#allocation2 + $0x39] sm:$0xff] %vm320_vm1, %v291_v15  ;;  %396 = vst.msk [vmem:[#allocation2 + $0xf9] sm:$0xff] %vm320_vm1, %v307_v16  ;;  %v319_v15 = vld [vmem:[%s6362_s17 + $0xf8] sm:$0xff] }
  0x37   : > { %381 = vst.msk [vmem:[#allocation2 + $0x49] sm:$0xff] %vm320_vm1, %v292_v17  ;;  %397 = vst.msk [vmem:[#allocation2 + $0x109] sm:$0xff] %vm320_vm1, %v308_v18 }
  0x38   : > { %382 = vst.msk [vmem:[#allocation2 + $0x51] sm:$0xff] %vm320_vm1, %v293_v19  ;;  %398 = vst.msk [vmem:[#allocation2 + $0x111] sm:$0xff] %vm320_vm1, %v309_v20 }
  0x39   : > { %383 = vst.msk [vmem:[#allocation2 + $0x61] sm:$0xff] %vm320_vm1, %v294_v21  ;;  %399 = vst.msk [vmem:[#allocation2 + $0x121] sm:$0xff] %vm320_vm1, %v310_v22  ;;  %v6415_v29 = vld [vmem:[#allocation2 + $0xc0] sm:$0xff]  ;;  %v6417_v30 = vld [vmem:[#allocation2 + $0xc8] sm:$0xff] }
  0x3a   : > { %384 = vst.msk [vmem:[#allocation2 + $0x69] sm:$0xff] %vm320_vm1, %v295_v23  ;;  %400 = vst.msk [vmem:[#allocation2 + $0x129] sm:$0xff] %vm320_vm1, %v311_v24  ;;  %v6419_v31 = vld [vmem:[#allocation2 + $0x18] sm:$0xff]  ;;  %5560 = vmatprep.mubr.msk.f32.mxu1 %vm320_vm1, %v6415_v29 }
  0x3b   : > { %385 = vst.msk [vmem:[#allocation2 + $0x79] sm:$0xff] %vm320_vm1, %v296_v25  ;;  %401 = vst.msk [vmem:[#allocation2 + $0x139] sm:$0xff] %vm320_vm1, %v312_v26  ;;  %5539 = vmatprep.mubr.msk.f32.mxu0 %vm320_vm1, %v6419_v31  ;;  %v6428_v32 = vld [vmem:[#allocation2 + $0xd8] sm:$0xff]  ;;  %v6430_v33 = vld [vmem:[#allocation2 + $0x20] sm:$0xff]  ;;  %5561 = vmatmul.mubr.msk.f32.vlgmr.msra.gmra.mxu1 %vm320_vm1, %v6417_v30 }
  0x3c   : > { %386 = vst.msk [vmem:[#allocation2 + $0x81] sm:$0xff] %vm320_vm1, %v297_v27  ;;  %402 = vst.msk [vmem:[#allocation2 + $0x141] sm:$0xff] %vm320_vm1, %v313_v28  ;;  %5540 = vmatmul.mubr.msk.f32.gmra.mxu0 %vm320_vm1, %v6430_v33  ;;  %v6441_v35 = vld [vmem:[#allocation2 + $0x30] sm:$0xff]  ;;  %5585 = vmatpush3.msk.msra.mxu1 %vm609_vm0, %v6328_v2  ;;  %v6449_v38 = vld [vmem:[#allocation2 + $0xe0] sm:$0xff] }
  0x3d   : > { %5563 = vmatprep.mubr.msk.f32.mxu1 %vm320_vm1, %v6428_v32  ;;  %v6451_v39 = vld [vmem:[#allocation2 + $0x38] sm:$0xff]  ;;  %387 = vst.msk [vmem:[#allocation2 + $0x91] sm:$0xff] %vm320_vm1, %v298_v36  ;;  %403 = vst.msk [vmem:[#allocation2 + $0x151] sm:$0xff] %vm320_vm1, %v314_v37  ;;  %5542 = vmatprep.mubr.msk.f32.mxu0 %vm320_vm1, %v6441_v35  ;;  %v6457_v40 = vld [vmem:[#allocation2 + $0xf0] sm:$0xff] }
  0x3e   : > { %v6459_v41 = vld [vmem:[#allocation2 + $0x48] sm:$0xff]  ;;  %5684 = vmatprep.subr.msk.mxu1 %vm609_vm0, %v6435_v34  ;;  %v6467_v42 = vld [vmem:[#allocation2 + $0xf8] sm:$0xff]  ;;  %388 = vst.msk [vmem:[#allocation2 + $0x99] sm:$0xff] %vm320_vm1, %v299_v46  ;;  %404 = vst.msk [vmem:[#allocation2 + $0x159] sm:$0xff] %vm320_vm1, %v315_v47 }
  0x3f   : > { %5564 = vmatmul.mubr.msk.f32.gmra.mxu1 %vm320_vm1, %v6449_v38  ;;  %v6473_v43 = vld [vmem:[#allocation2 + $0x108] sm:$0xff]  ;;  %v6475_v44 = vld [vmem:[#allocation2 + $0x50] sm:$0xff]  ;;  %389 = vst.msk [vmem:[#allocation2 + $0xa9] sm:$0xff] %vm320_vm1, %v300_v48  ;;  %405 = vst.msk [vmem:[#allocation2 + $0x169] sm:$0xff] %vm320_vm1, %v316_v49 }
  0x40   : > { %5543 = vmatmul.mubr.msk.f32.gmra.mxu0 %vm320_vm1, %v6451_v39  ;;  %5566 = vmatprep.mubr.msk.f32.mxu1 %vm320_vm1, %v6457_v40  ;;  %v6477_v45 = vld [vmem:[#allocation2 + $0x60] sm:$0xff]  ;;  %390 = vst.msk [vmem:[#allocation2 + $0xb1] sm:$0xff] %vm320_vm1, %v301_v50  ;;  %406 = vst.msk [vmem:[#allocation2 + $0x171] sm:$0xff] %vm320_vm1, %v317_v51  ;;  %v6497_v52 = vld [vmem:[#allocation2 + $0x110] sm:$0xff] }
  0x41   : > { %5545 = vmatprep.mubr.msk.f32.mxu0 %vm320_vm1, %v6459_v41  ;;  %v6501_v53 = vld [vmem:[#allocation2 + $0x68] sm:$0xff]  ;;  %v6503_v54 = vld [vmem:[#allocation2 + $0x120] sm:$0xff]  ;;  %v6583_v13 = vld [vmem:[#allocation2 + $0x32] sm:$0xff]  ;;  %408 = vst.msk [vmem:[#allocation2 + $0x189] sm:$0xff] %vm320_vm1, %v319_v15 }
  0x42   : > { %v6505_v55 = vld [vmem:[#allocation2 + $0x78] sm:$0xff]  ;;  %v6513_v56 = vld [vmem:[#allocation2 + $0x128] sm:$0xff]  ;;  %7953 = vst [vmem:[#allocation13_spill] sm:$0xff] %v6583_v13 }
  0x43   : > { %5567 = vmatmul.mubr.msk.f32.gmra.mxu1 %vm320_vm1, %v6467_v42  ;;  %v6517_v57 = vld [vmem:[#allocation2 + $0x80] sm:$0xff]  ;;  %v6519_v58 = vld [vmem:[#allocation2 + $0x138] sm:$0xff]  ;;  %v6609_v19 = vld [vmem:[#allocation2 + $0x4a] sm:$0xff] }
  0x44   : > { %5546 = vmatmul.mubr.msk.f32.gmra.mxu0 %vm320_vm1, %v6475_v44  ;;  %5569 = vmatprep.mubr.msk.f32.mxu1 %vm320_vm1, %v6473_v43  ;;  %v6521_v59 = vld [vmem:[#allocation2 + $0x90] sm:$0xff]  ;;  %v6529_v60 = vld [vmem:[#allocation2 + $0x140] sm:$0xff]  ;;  %7955 = vst [vmem:[#allocation15_spill] sm:$0xff] %v6609_v19 }
  0x45   : > { %5548 = vmatprep.mubr.msk.f32.mxu0 %vm320_vm1, %v6477_v45  ;;  %v6533_v61 = vld [vmem:[#allocation2 + $0x98] sm:$0xff]  ;;  %v6535_v62 = vld [vmem:[#allocation2 + $0x150] sm:$0xff]  ;;  %v6575_v11 = vld [vmem:[#allocation2 + $0x22] sm:$0xff] }
  0x46   : > { %v6537_v63 = vld [vmem:[#allocation2 + $0xa8] sm:$0xff]  ;;  %v6545_v0 = vld [vmem:[#allocation2 + $0x158] sm:$0xff]  ;;  %7952 = vst [vmem:[#allocation12_spill] sm:$0xff] %v6575_v11 }
  0x47   : > { %5570 = vmatmul.mubr.msk.f32.gmra.mxu1 %vm320_vm1, %v6497_v52  ;;  %v6549_v1 = vld [vmem:[#allocation2 + $0xb0] sm:$0xff]  ;;  %v6551_v2 = vld [vmem:[#allocation2 + $0x168] sm:$0xff]  ;;  %v6562_v7 = vld [vmem:[#allocation2 + $0x1a] sm:$0xff] }
  0x48   : > { %5549 = vmatmul.mubr.msk.f32.gmra.mxu0 %vm320_vm1, %v6501_v53  ;;  %5572 = vmatprep.mubr.msk.f32.mxu1 %vm320_vm1, %v6503_v54  ;;  %v6559_v4 = vld [vmem:[#allocation2 + $0x170] sm:$0xff]  ;;  %7951 = vst [vmem:[#allocation11_spill] sm:$0xff] %v6562_v7  ;;  %v6577_v12 = vld [vmem:[#allocation2 + $0x19] sm:$0xff]  ;;  %v6599_v16 = vld [vmem:[#allocation2 + $0x21] sm:$0xff] }
  0x49   : > { %5551 = vmatprep.mubr.msk.f32.mxu0 %vm320_vm1, %v6505_v55  ;;  %v6601_v17 = vld [vmem:[#allocation2 + $0x3a] sm:$0xff]  ;;  %v6605_v18 = vld [vmem:[#allocation2 + $0x31] sm:$0xff]  ;;  %v6625_v22 = vld [vmem:[#allocation2 + $0x49] sm:$0xff] }
  0x4a   : > { %7954 = vst [vmem:[#allocation14_spill] sm:$0xff] %v6601_v17  ;;  %v6619_v20 = vld [vmem:[#allocation2 + $0x39] sm:$0xff]  ;;  %v6627_v23 = vld [vmem:[#allocation2 + $0x62] sm:$0xff]  ;;  %v6635_v24 = vld [vmem:[#allocation2 + $0x51] sm:$0xff] }
  0x4b   : > { %5573 = vmatmul.mubr.msk.f32.gmra.mxu1 %vm320_vm1, %v6513_v56  ;;  %v6623_v21 = vld [vmem:[#allocation2 + $0x52] sm:$0xff]  ;;  %7957 = vst [vmem:[#allocation17_spill] sm:$0xff] %v6627_v23  ;;  %v6639_v25 = vld [vmem:[#allocation2 + $0x6a] sm:$0xff]  ;;  %v6641_v26 = vld [vmem:[#allocation2 + $0x61] sm:$0xff] }
  0x4c   : > { %5552 = vmatmul.mubr.msk.f32.gmra.mxu0 %vm320_vm1, %v6517_v57  ;;  %5575 = vmatprep.mubr.msk.f32.mxu1 %vm320_vm1, %v6519_v58  ;;  %7956 = vst [vmem:[#allocation16_spill] sm:$0xff] %v6623_v21  ;;  %7958 = vst [vmem:[#allocation18_spill] sm:$0xff] %v6639_v25  ;;  %v6643_v27 = vld [vmem:[#allocation2 + $0x7a] sm:$0xff]  ;;  %v6651_v28 = vld [vmem:[#allocation2 + $0x69] sm:$0xff] }
  0x4d   : > { %5554 = vmatprep.mubr.msk.f32.mxu0 %vm320_vm1, %v6521_v59  ;;  %7959 = vst [vmem:[#allocation19_spill] sm:$0xff] %v6643_v27  ;;  %v6657_v36 = vld [vmem:[#allocation2 + $0x79] sm:$0xff]  ;;  %v6667_v46 = vld [vmem:[#allocation2 + $0x81] sm:$0xff]  ;;  %v6673_v48 = vld [vmem:[#allocation2 + $0x91] sm:$0xff] }
  0x4e   : > { %v6659_v37 = vld [vmem:[#allocation2 + $0x92] sm:$0xff]  ;;  %v6671_v47 = vld [vmem:[#allocation2 + $0x9a] sm:$0xff]  ;;  %v6675_v49 = vld [vmem:[#allocation2 + $0xaa] sm:$0xff] }
  0x4f   : > { %5576 = vmatmul.mubr.msk.f32.gmra.mxu1 %vm320_vm1, %v6529_v60  ;;  %7961 = vst [vmem:[#allocation21_spill] sm:$0xff] %v6659_v37  ;;  %7962 = vst [vmem:[#allocation22_spill] sm:$0xff] %v6671_v47  ;;  %v6683_v50 = vld [vmem:[#allocation2 + $0x99] sm:$0xff] }
  0x50   : > { %5555 = vmatmul.mubr.msk.f32.gmra.mxu0 %vm320_vm1, %v6533_v61  ;;  %5578 = vmatprep.mubr.msk.f32.mxu1 %vm320_vm1, %v6535_v62  ;;  %7963 = vst [vmem:[#allocation23_spill] sm:$0xff] %v6675_v49  ;;  %v6687_v51 = vld [vmem:[#allocation2 + $0xb2] sm:$0xff]  ;;  %v6707_v15 = vld [vmem:[#allocation2 + $0xda] sm:$0xff] }
  0x51   : > { %5557 = vmatprep.mubr.msk.f32.mxu0 %vm320_vm1, %v6537_v63  ;;  %7964 = vst [vmem:[#allocation24_spill] sm:$0xff] %v6687_v51  ;;  %7967 = vst [vmem:[#allocation27_spill] sm:$0xff] %v6707_v15 }
  0x53   : > { %5579 = vmatmul.mubr.msk.f32.gmra.mxu1 %vm320_vm1, %v6545_v0 }
  0x54   : > { %5558 = vmatmul.mubr.msk.f32.gmra.mxu0 %vm320_vm1, %v6549_v1  ;;  %5581 = vmatprep.mubr.msk.f32.mxu1 %vm320_vm1, %v6551_v2 }
  0x55   : > { %5636 = vmatprep.mubr.msk.f32.mxu0 %vm320_vm1, %v1356_v3  ;;  %v6689_v3 = vld [vmem:[#allocation2 + $0xa9] sm:$0xff] }
  0x57   : > { %5582 = vmatmul.mubr.msk.f32.gmra.mxu1 %vm320_vm1, %v6559_v4 }
  0x58   : > { %5637 = vmatmul.mubr.msk.f32.vlgmr.msra.gmra.mxu0 %vm320_vm1, %v1357_v5  ;;  %5586 = vmatprep.mubr.msk.f32.mxu1 %vm320_vm1, %v902_v6  ;;  %v6691_v5 = vld [vmem:[#allocation2 + $0xc2] sm:$0xff]  ;;  %v6699_v6 = vld [vmem:[#allocation2 + $0xb1] sm:$0xff] }
  0x59   : > { %5735 = vmatpush3.msk.msra.mxu0 %vm609_vm0, %v6376_v10  ;;  %5639 = vmatprep.mubr.msk.f32.mxu0 %vm320_vm1, %v6562_v7  ;;  %v318_v10 = vld [vmem:[%s6362_s17 + $0xf0] sm:$0xff]  ;;  %7965 = vst [vmem:[#allocation25_spill] sm:$0xff] %v6691_v5  ;;  %s6058_s17 = sshll.u32 %s6189_s16, 4  ;;  %s6059_s17 = int_to_ptr.vmem [resolvable:$false] %s6058_s17 }
  0x5a   : > { %5834 = vmatprep.subr.msk.mxu0 %vm609_vm0, %v6567_v8  ;;  %407 = vst.msk [vmem:[#allocation2 + $0x181] sm:$0xff] %vm320_vm1, %v318_v10  ;;  %v6705_v10 = vld [vmem:[#allocation2 + $0xc1] sm:$0xff]  ;;  %v6817_v7 = vld [vmem:[#allocation2 + $0x169] sm:$0xff]  ;;  %s6060_s27 = scalar_lea.vmem %s6059_s17, 8192  ;;  %p6061_p1 = scmp.lt.s32.totalorder %s7771_s10, %s6059_s17 }
  0x5b   : > { %5587 = vmatmul.mubr.msk.f32.vlgmr.msra.gmra.mxu1 %vm320_vm1, %v903_v9  ;;  %v6703_v9 = vld [vmem:[#allocation2 + $0xca] sm:$0xff]  ;;  %p6062_p2 = scmp.lt.s32.totalorder %s6060_s27, %s6054_s15 }
  0x5c   : > { %5640 = vmatmul.mubr.msk.f32.gmra.mxu0 %vm320_vm1, %v6575_v11  ;;  %5685 = vmatpush3.msk.msra.mxu1 %vm609_vm0, %v6435_v34  ;;  %v6655_v34 = vld [vmem:[#allocation2 + $0x82] sm:$0xff]  ;;  %7966 = vst [vmem:[#allocation26_spill] sm:$0xff] %v6703_v9  ;;  %v6803_v11 = vld [vmem:[#allocation2 + $0x16a] sm:$0xff] }
  0x5d   : > { %5589 = vmatprep.mubr.msk.f32.mxu1 %vm320_vm1, %v6577_v12  ;;  %5642 = vmatprep.mubr.msk.f32.mxu0 %vm320_vm1, %v6583_v13  ;;  %7960 = vst [vmem:[#allocation20_spill] sm:$0xff] %v6655_v34  ;;  %v6801_v13 = vld [vmem:[#allocation2 + $0x151] sm:$0xff]  ;;  %7979 = vst [vmem:[#allocation39_spill] sm:$0xff] %v6803_v11  ;;  %p6063_p3 = por %p6062_p2, %p6061_p1 }
  0x5e   : > { %5784 = vmatprep.subr.msk.mxu1 %vm609_vm0, %v6588_v14 }
  0x5f   : > { %5590 = vmatmul.mubr.msk.f32.gmra.mxu1 %vm320_vm1, %v6599_v16  ;;  %p6064_p5 = pnand %p6063_p3, %p6057_p0 }
  0x60   : > { %5643 = vmatmul.mubr.msk.f32.gmra.mxu0 %vm320_vm1, %v6601_v17  ;;  %5592 = vmatprep.mubr.msk.f32.mxu1 %vm320_vm1, %v6605_v18  ;;  %v6787_v17 = vld [vmem:[#allocation2 + $0x152] sm:$0xff] }
  0x61   : > { %5645 = vmatprep.mubr.msk.f32.mxu0 %vm320_vm1, %v6609_v19  ;;  %v6785_v19 = vld [vmem:[#allocation2 + $0x139] sm:$0xff]  ;;  %7977 = vst [vmem:[#allocation37_spill] sm:$0xff] %v6787_v17 }
  0x63   : > { %5593 = vmatmul.mubr.msk.f32.gmra.mxu1 %vm320_vm1, %v6619_v20 }
  0x64   : > { %5646 = vmatmul.mubr.msk.f32.gmra.mxu0 %vm320_vm1, %v6623_v21  ;;  %5595 = vmatprep.mubr.msk.f32.mxu1 %vm320_vm1, %v6625_v22  ;;  %v6771_v21 = vld [vmem:[#allocation2 + $0x13a] sm:$0xff] }
  0x65   : > { %5648 = vmatprep.mubr.msk.f32.mxu0 %vm320_vm1, %v6627_v23  ;;  %v6769_v23 = vld [vmem:[#allocation2 + $0x121] sm:$0xff]  ;;  %7975 = vst [vmem:[#allocation35_spill] sm:$0xff] %v6771_v21 }
  0x67   : > { %5596 = vmatmul.mubr.msk.f32.gmra.mxu1 %vm320_vm1, %v6635_v24 }
  0x68   : > { %5649 = vmatmul.mubr.msk.f32.gmra.mxu0 %vm320_vm1, %v6639_v25  ;;  %5598 = vmatprep.mubr.msk.f32.mxu1 %vm320_vm1, %v6641_v26  ;;  %v6755_v25 = vld [vmem:[#allocation2 + $0x122] sm:$0xff] }
  0x69   : > { %5651 = vmatprep.mubr.msk.f32.mxu0 %vm320_vm1, %v6643_v27  ;;  %v6753_v27 = vld [vmem:[#allocation2 + $0x109] sm:$0xff]  ;;  %7973 = vst [vmem:[#allocation33_spill] sm:$0xff] %v6755_v25 }
  0x6b   : > { %5599 = vmatmul.mubr.msk.f32.gmra.mxu1 %vm320_vm1, %v6651_v28 }
  0x6c   : > { %5652 = vmatmul.mubr.msk.f32.gmra.mxu0 %vm320_vm1, %v6655_v34  ;;  %5601 = vmatprep.mubr.msk.f32.mxu1 %vm320_vm1, %v6657_v36  ;;  %v6739_v34 = vld [vmem:[#allocation2 + $0x10a] sm:$0xff] }
  0x6d   : > { %5654 = vmatprep.mubr.msk.f32.mxu0 %vm320_vm1, %v6659_v37  ;;  %v6737_v37 = vld [vmem:[#allocation2 + $0xf1] sm:$0xff]  ;;  %7971 = vst [vmem:[#allocation31_spill] sm:$0xff] %v6739_v34 }
  0x6f   : > { %5602 = vmatmul.mubr.msk.f32.gmra.mxu1 %vm320_vm1, %v6667_v46 }
  0x70   : > { %5655 = vmatmul.mubr.msk.f32.gmra.mxu0 %vm320_vm1, %v6671_v47  ;;  %5604 = vmatprep.mubr.msk.f32.mxu1 %vm320_vm1, %v6673_v48  ;;  %v6723_v47 = vld [vmem:[#allocation2 + $0xf2] sm:$0xff] }
  0x71   : > { %5657 = vmatprep.mubr.msk.f32.mxu0 %vm320_vm1, %v6675_v49  ;;  %v6721_v49 = vld [vmem:[#allocation2 + $0xd9] sm:$0xff]  ;;  %7969 = vst [vmem:[#allocation29_spill] sm:$0xff] %v6723_v47 }
  0x73   : > { %5605 = vmatmul.mubr.msk.f32.gmra.mxu1 %vm320_vm1, %v6683_v50 }
  0x74   : > { %5658 = vmatmul.mubr.msk.f32.gmra.mxu0 %vm320_vm1, %v6687_v51  ;;  %5607 = vmatprep.mubr.msk.f32.mxu1 %vm320_vm1, %v6689_v3  ;;  %v6715_v51 = vld [vmem:[#allocation2 + $0xc9] sm:$0xff] }
  0x75   : > { %5660 = vmatprep.mubr.msk.f32.mxu0 %vm320_vm1, %v6691_v5  ;;  %v6719_v5 = vld [vmem:[#allocation2 + $0xe2] sm:$0xff] }
  0x76   : > { %7968 = vst [vmem:[#allocation28_spill] sm:$0xff] %v6719_v5 }
  0x77   : > { %5608 = vmatmul.mubr.msk.f32.gmra.mxu1 %vm320_vm1, %v6699_v6 }
  0x78   : > { %5661 = vmatmul.mubr.msk.f32.gmra.mxu0 %vm320_vm1, %v6703_v9  ;;  %5610 = vmatprep.mubr.msk.f32.mxu1 %vm320_vm1, %v6705_v10  ;;  %v6731_v9 = vld [vmem:[#allocation2 + $0xe1] sm:$0xff] }
  0x79   : > { %5663 = vmatprep.mubr.msk.f32.mxu0 %vm320_vm1, %v6707_v15  ;;  %v6735_v15 = vld [vmem:[#allocation2 + $0xfa] sm:$0xff] }
  0x7a   : > { %7970 = vst [vmem:[#allocation30_spill] sm:$0xff] %v6735_v15 }
  0x7b   : > { %5611 = vmatmul.mubr.msk.f32.gmra.mxu1 %vm320_vm1, %v6715_v51 }
  0x7c   : > { %5664 = vmatmul.mubr.msk.f32.gmra.mxu0 %vm320_vm1, %v6719_v5  ;;  %5613 = vmatprep.mubr.msk.f32.mxu1 %vm320_vm1, %v6721_v49  ;;  %v6747_v5 = vld [vmem:[#allocation2 + $0xf9] sm:$0xff] }
  0x7d   : > { %5666 = vmatprep.mubr.msk.f32.mxu0 %vm320_vm1, %v6723_v47  ;;  %v6751_v47 = vld [vmem:[#allocation2 + $0x112] sm:$0xff] }
  0x7e   : > { %7972 = vst [vmem:[#allocation32_spill] sm:$0xff] %v6751_v47 }
  0x7f   : > { %5614 = vmatmul.mubr.msk.f32.gmra.mxu1 %vm320_vm1, %v6731_v9 }
  0x80   : > { %5667 = vmatmul.mubr.msk.f32.gmra.mxu0 %vm320_vm1, %v6735_v15  ;;  %5616 = vmatprep.mubr.msk.f32.mxu1 %vm320_vm1, %v6737_v37  ;;  %v6763_v15 = vld [vmem:[#allocation2 + $0x111] sm:$0xff] }
  0x81   : > { %5669 = vmatprep.mubr.msk.f32.mxu0 %vm320_vm1, %v6739_v34  ;;  %v6767_v34 = vld [vmem:[#allocation2 + $0x12a] sm:$0xff] }
  0x82   : > { %7974 = vst [vmem:[#allocation34_spill] sm:$0xff] %v6767_v34 }
  0x83   : > { %5617 = vmatmul.mubr.msk.f32.gmra.mxu1 %vm320_vm1, %v6747_v5 }
  0x84   : > { %5670 = vmatmul.mubr.msk.f32.gmra.mxu0 %vm320_vm1, %v6751_v47  ;;  %5619 = vmatprep.mubr.msk.f32.mxu1 %vm320_vm1, %v6753_v27  ;;  %v6779_v47 = vld [vmem:[#allocation2 + $0x129] sm:$0xff] }
  0x85   : > { %5672 = vmatprep.mubr.msk.f32.mxu0 %vm320_vm1, %v6755_v25  ;;  %v6783_v25 = vld [vmem:[#allocation2 + $0x142] sm:$0xff] }
  0x86   : > { %7976 = vst [vmem:[#allocation36_spill] sm:$0xff] %v6783_v25 }
  0x87   : > { %5620 = vmatmul.mubr.msk.f32.gmra.mxu1 %vm320_vm1, %v6763_v15 }
  0x88   : > { %5673 = vmatmul.mubr.msk.f32.gmra.mxu0 %vm320_vm1, %v6767_v34  ;;  %5622 = vmatprep.mubr.msk.f32.mxu1 %vm320_vm1, %v6769_v23  ;;  %v6795_v34 = vld [vmem:[#allocation2 + $0x141] sm:$0xff] }
  0x89   : > { %5675 = vmatprep.mubr.msk.f32.mxu0 %vm320_vm1, %v6771_v21  ;;  %v6799_v21 = vld [vmem:[#allocation2 + $0x15a] sm:$0xff] }
  0x8a   : > { %7978 = vst [vmem:[#allocation38_spill] sm:$0xff] %v6799_v21 }
  0x8b   : > { %5623 = vmatmul.mubr.msk.f32.gmra.mxu1 %vm320_vm1, %v6779_v47 }
  0x8c   : > { %5676 = vmatmul.mubr.msk.f32.gmra.mxu0 %vm320_vm1, %v6783_v25  ;;  %5625 = vmatprep.mubr.msk.f32.mxu1 %vm320_vm1, %v6785_v19  ;;  %v6811_v25 = vld [vmem:[#allocation2 + $0x159] sm:$0xff] }
  0x8d   : > { %5678 = vmatprep.mubr.msk.f32.mxu0 %vm320_vm1, %v6787_v17  ;;  %v6815_v17 = vld [vmem:[#allocation2 + $0x172] sm:$0xff] }
  0x8f   : > { %5626 = vmatmul.mubr.msk.f32.gmra.mxu1 %vm320_vm1, %v6795_v34 }
  0x90   : > { %5679 = vmatmul.mubr.msk.f32.gmra.mxu0 %vm320_vm1, %v6799_v21  ;;  %5628 = vmatprep.mubr.msk.f32.mxu1 %vm320_vm1, %v6801_v13  ;;  %v6825_v21 = vld [vmem:[#allocation2 + $0x171] sm:$0xff] }
  0x91   : > { %5681 = vmatprep.mubr.msk.f32.mxu0 %vm320_vm1, %v6803_v11  ;;  %v6832_v11 = vld [vmem:[%s7893_s1 + $0x20] sm:$0xf] }
  0x93   : > { %5629 = vmatmul.mubr.msk.f32.gmra.mxu1 %vm320_vm1, %v6811_v25 }
  0x94   : > { %5682 = vmatmul.mubr.msk.f32.gmra.mxu0 %vm320_vm1, %v6815_v17  ;;  %5631 = vmatprep.mubr.msk.f32.mxu1 %vm320_vm1, %v6817_v7 }
  0x95   : > { %5736 = vmatprep.mubr.msk.f32.mxu0 %vm320_vm1, %v6577_v12  ;;  %v6849_v12 = vld [vmem:[%s7893_s1 + $0x1c] sm:$0xf] }
  0x97   : > { %5632 = vmatmul.mubr.msk.f32.gmra.mxu1 %vm320_vm1, %v6825_v21 }
  0x98   : > { %5737 = vmatmul.mubr.msk.f32.vlgmr.msra.gmra.mxu0 %vm320_vm1, %v6599_v16  ;;  %5686 = vmatprep.mubr.msk.f32.mxu1 %vm320_vm1, %v6419_v31  ;;  %v6959_v31 = vld [vmem:[#allocation2 + $0x181] sm:$0xff]  ;;  %v7998_v16 = vld [vmem:[#allocation27_spill] sm:$0xff] }
  0x99   : > { %5835 = vmatpush3.msk.msra.mxu0 %vm609_vm0, %v6567_v8  ;;  %5739 = vmatprep.mubr.msk.f32.mxu0 %vm320_vm1, %v6605_v18  ;;  %7980 = vst [vmem:[#allocation40_spill] sm:$0xff] %v6959_v31  ;;  %v6971_v8 = vld [vmem:[#allocation2 + $0x180] sm:$0xff] }
  0x9a   : > { %5934 = vmatprep.subr.msk.mxu0 %vm609_vm0, %v6832_v11 }
  0x9b   : > { %5687 = vmatmul.mubr.msk.f32.vlgmr.msra.gmra.mxu1 %vm320_vm1, %v6430_v33  ;;  %v6969_v33 = vld [vmem:[#allocation2 + $0x189] sm:$0xff] }
  0x9c   : > { %5740 = vmatmul.mubr.msk.f32.gmra.mxu0 %vm320_vm1, %v6619_v20  ;;  %5785 = vmatpush3.msk.msra.mxu1 %vm609_vm0, %v6588_v14  ;;  %7981 = vst [vmem:[#allocation41_spill] sm:$0xff] %v6969_v33  ;;  %v7983_v14 = vld [vmem:[#allocation12_spill] sm:$0xff] }
  0x9d   : > { %5689 = vmatprep.mubr.msk.f32.mxu1 %vm320_vm1, %v6441_v35  ;;  %5742 = vmatprep.mubr.msk.f32.mxu0 %vm320_vm1, %v6625_v22 }
  0x9e   : > { %5884 = vmatprep.subr.msk.mxu1 %vm609_vm0, %v6849_v12 }
  0x9f   : > { %5690 = vmatmul.mubr.msk.f32.gmra.mxu1 %vm320_vm1, %v6451_v39 }
  0xa0   : > { %5743 = vmatmul.mubr.msk.f32.gmra.mxu0 %vm320_vm1, %v6635_v24  ;;  %5692 = vmatprep.mubr.msk.f32.mxu1 %vm320_vm1, %v6459_v41 }
  0xa1   : > { %5745 = vmatprep.mubr.msk.f32.mxu0 %vm320_vm1, %v6641_v26 }
  0xa3   : > { %5693 = vmatmul.mubr.msk.f32.gmra.mxu1 %vm320_vm1, %v6475_v44 }
  0xa4   : > { %5746 = vmatmul.mubr.msk.f32.gmra.mxu0 %vm320_vm1, %v6651_v28  ;;  %5695 = vmatprep.mubr.msk.f32.mxu1 %vm320_vm1, %v6477_v45 }
  0xa5   : > { %5748 = vmatprep.mubr.msk.f32.mxu0 %vm320_vm1, %v6657_v36 }
  0xa7   : > { %5696 = vmatmul.mubr.msk.f32.gmra.mxu1 %vm320_vm1, %v6501_v53 }
  0xa8   : > { %5749 = vmatmul.mubr.msk.f32.gmra.mxu0 %vm320_vm1, %v6667_v46  ;;  %5698 = vmatprep.mubr.msk.f32.mxu1 %vm320_vm1, %v6505_v55 }
  0xa9   : > { %5751 = vmatprep.mubr.msk.f32.mxu0 %vm320_vm1, %v6673_v48 }
  0xab   : > { %5699 = vmatmul.mubr.msk.f32.gmra.mxu1 %vm320_vm1, %v6517_v57 }
  0xac   : > { %5752 = vmatmul.mubr.msk.f32.gmra.mxu0 %vm320_vm1, %v6683_v50  ;;  %5701 = vmatprep.mubr.msk.f32.mxu1 %vm320_vm1, %v6521_v59 }
  0xad   : > { %5754 = vmatprep.mubr.msk.f32.mxu0 %vm320_vm1, %v6689_v3 }
  0xaf   : > { %5702 = vmatmul.mubr.msk.f32.gmra.mxu1 %vm320_vm1, %v6533_v61 }
  0xb0   : > { %5755 = vmatmul.mubr.msk.f32.gmra.mxu0 %vm320_vm1, %v6699_v6  ;;  %5704 = vmatprep.mubr.msk.f32.mxu1 %vm320_vm1, %v6537_v63 }
  0xb1   : > { %5757 = vmatprep.mubr.msk.f32.mxu0 %vm320_vm1, %v6705_v10 }
  0xb3   : > { %5705 = vmatmul.mubr.msk.f32.gmra.mxu1 %vm320_vm1, %v6549_v1 }
  0xb4   : > { %5758 = vmatmul.mubr.msk.f32.gmra.mxu0 %vm320_vm1, %v6715_v51  ;;  %5707 = vmatprep.mubr.msk.f32.mxu1 %vm320_vm1, %v6415_v29 }
  0xb5   : > { %5760 = vmatprep.mubr.msk.f32.mxu0 %vm320_vm1, %v6721_v49 }
  0xb7   : > { %5708 = vmatmul.mubr.msk.f32.gmra.mxu1 %vm320_vm1, %v6417_v30 }
  0xb8   : > { %5761 = vmatmul.mubr.msk.f32.gmra.mxu0 %vm320_vm1, %v6731_v9  ;;  %5710 = vmatprep.mubr.msk.f32.mxu1 %vm320_vm1, %v6428_v32 }
  0xb9   : > { %5763 = vmatprep.mubr.msk.f32.mxu0 %vm320_vm1, %v6737_v37 }
  0xbb   : > { %5711 = vmatmul.mubr.msk.f32.gmra.mxu1 %vm320_vm1, %v6449_v38 }
  0xbc   : > { %5764 = vmatmul.mubr.msk.f32.gmra.mxu0 %vm320_vm1, %v6747_v5  ;;  %5713 = vmatprep.mubr.msk.f32.mxu1 %vm320_vm1, %v6457_v40 }
  0xbd   : > { %5766 = vmatprep.mubr.msk.f32.mxu0 %vm320_vm1, %v6753_v27 }
  0xbf   : > { %5714 = vmatmul.mubr.msk.f32.gmra.mxu1 %vm320_vm1, %v6467_v42 }
  0xc0   : > { %5767 = vmatmul.mubr.msk.f32.gmra.mxu0 %vm320_vm1, %v6763_v15  ;;  %5716 = vmatprep.mubr.msk.f32.mxu1 %vm320_vm1, %v6473_v43 }
  0xc1   : > { %5769 = vmatprep.mubr.msk.f32.mxu0 %vm320_vm1, %v6769_v23 }
  0xc3   : > { %5717 = vmatmul.mubr.msk.f32.gmra.mxu1 %vm320_vm1, %v6497_v52 }
  0xc4   : > { %5770 = vmatmul.mubr.msk.f32.gmra.mxu0 %vm320_vm1, %v6779_v47  ;;  %5719 = vmatprep.mubr.msk.f32.mxu1 %vm320_vm1, %v6503_v54  ;;  %v8003_v47 = vld [vmem:[#allocation32_spill] sm:$0xff] }
  0xc5   : > { %5772 = vmatprep.mubr.msk.f32.mxu0 %vm320_vm1, %v6785_v19  ;;  %v7999_v19 = vld [vmem:[#allocation28_spill] sm:$0xff] }
  0xc7   : > { %5720 = vmatmul.mubr.msk.f32.gmra.mxu1 %vm320_vm1, %v6513_v56 }
  0xc8   : > { %5773 = vmatmul.mubr.msk.f32.gmra.mxu0 %vm320_vm1, %v6795_v34  ;;  %5722 = vmatprep.mubr.msk.f32.mxu1 %vm320_vm1, %v6519_v58 }
  0xc9   : > { %5775 = vmatprep.mubr.msk.f32.mxu0 %vm320_vm1, %v6801_v13  ;;  %v7982_v13 = vld [vmem:[#allocation11_spill] sm:$0xff] }
  0xcb   : > { %5723 = vmatmul.mubr.msk.f32.gmra.mxu1 %vm320_vm1, %v6529_v60 }
  0xcc   : > { %5776 = vmatmul.mubr.msk.f32.gmra.mxu0 %vm320_vm1, %v6811_v25  ;;  %5725 = vmatprep.mubr.msk.f32.mxu1 %vm320_vm1, %v6535_v62  ;;  %v8001_v25 = vld [vmem:[#allocation30_spill] sm:$0xff] }
  0xcd   : > { %5778 = vmatprep.mubr.msk.f32.mxu0 %vm320_vm1, %v6817_v7  ;;  %v6979_v7 = vld [vmem:[#allocation2 + $0x188] sm:$0xff] }
  0xcf   : > { %5726 = vmatmul.mubr.msk.f32.gmra.mxu1 %vm320_vm1, %v6545_v0 }
  0xd0   : > { %5779 = vmatmul.mubr.msk.f32.gmra.mxu0 %vm320_vm1, %v6825_v21  ;;  %5728 = vmatprep.mubr.msk.f32.mxu1 %vm320_vm1, %v6551_v2  ;;  %v8000_v21 = vld [vmem:[#allocation29_spill] sm:$0xff] }
  0xd1   : > { %5781 = vmatprep.mubr.msk.f32.mxu0 %vm320_vm1, %v6959_v31 }
  0xd3   : > { %5729 = vmatmul.mubr.msk.f32.gmra.mxu1 %vm320_vm1, %v6559_v4 }
  0xd4   : > { %5782 = vmatmul.mubr.msk.f32.gmra.mxu0 %vm320_vm1, %v6969_v33  ;;  %5731 = vmatprep.mubr.msk.f32.mxu1 %vm320_vm1, %v6971_v8  ;;  %v8012_v33 = vld [vmem:[#allocation38_spill] sm:$0xff] }
  0xd5   : > { %5836 = vmatprep.mubr.msk.f32.mxu0 %vm320_vm1, %v6441_v35  ;;  %v7984_v35 = vld [vmem:[#allocation13_spill] sm:$0xff] }
  0xd7   : > { %5732 = vmatmul.mubr.msk.f32.gmra.mxu1 %vm320_vm1, %v6979_v7 }
  0xd8   : > { %5837 = vmatmul.mubr.msk.f32.vlgmr.msra.gmra.mxu0 %vm320_vm1, %v6451_v39  ;;  %5786 = vmatprep.mubr.msk.f32.mxu1 %vm320_vm1, %v7982_v13  ;;  %v7985_v39 = vld [vmem:[#allocation14_spill] sm:$0xff] }
  0xd9   : > { %5935 = vmatpush3.msk.msra.mxu0 %vm609_vm0, %v6832_v11  ;;  %5839 = vmatprep.mubr.msk.f32.mxu0 %vm320_vm1, %v6459_v41  ;;  %v7986_v41 = vld [vmem:[#allocation15_spill] sm:$0xff]  ;;  %v7988_v11 = vld [vmem:[#allocation17_spill] sm:$0xff]  ;;  %v8005_v13 = vld [vmem:[#allocation34_spill] sm:$0xff] }
  0xdb   : > { %5787 = vmatmul.mubr.msk.f32.vlgmr.msra.gmra.mxu1 %vm320_vm1, %v7983_v14 }
  0xdc   : > { %5840 = vmatmul.mubr.msk.f32.gmra.mxu0 %vm320_vm1, %v6475_v44  ;;  %5885 = vmatpush3.msk.msra.mxu1 %vm609_vm0, %v6849_v12  ;;  %v7987_v44 = vld [vmem:[#allocation16_spill] sm:$0xff] }
  0xdd   : > { %5789 = vmatprep.mubr.msk.f32.mxu1 %vm320_vm1, %v7984_v35  ;;  %5842 = vmatprep.mubr.msk.f32.mxu0 %vm320_vm1, %v6477_v45  ;;  %v7989_v45 = vld [vmem:[#allocation18_spill] sm:$0xff] }
  0xdf   : > { %5790 = vmatmul.mubr.msk.f32.gmra.mxu1 %vm320_vm1, %v7985_v39 }
  0xe0   : > { %5843 = vmatmul.mubr.msk.f32.gmra.mxu0 %vm320_vm1, %v6501_v53  ;;  %5792 = vmatprep.mubr.msk.f32.mxu1 %vm320_vm1, %v7986_v41  ;;  %v7990_v53 = vld [vmem:[#allocation19_spill] sm:$0xff] }
  0xe1   : > { %5845 = vmatprep.mubr.msk.f32.mxu0 %vm320_vm1, %v6505_v55  ;;  %v7991_v55 = vld [vmem:[#allocation20_spill] sm:$0xff] }
  0xe3   : > { %5793 = vmatmul.mubr.msk.f32.gmra.mxu1 %vm320_vm1, %v7987_v44 }
  0xe4   : > { %5846 = vmatmul.mubr.msk.f32.gmra.mxu0 %vm320_vm1, %v6517_v57  ;;  %5795 = vmatprep.mubr.msk.f32.mxu1 %vm320_vm1, %v7988_v11  ;;  %v7992_v57 = vld [vmem:[#allocation21_spill] sm:$0xff] }
  0xe5   : > { %5848 = vmatprep.mubr.msk.f32.mxu0 %vm320_vm1, %v6521_v59  ;;  %v7993_v59 = vld [vmem:[#allocation22_spill] sm:$0xff] }
  0xe7   : > { %5796 = vmatmul.mubr.msk.f32.gmra.mxu1 %vm320_vm1, %v7989_v45 }
  0xe8   : > { %5849 = vmatmul.mubr.msk.f32.gmra.mxu0 %vm320_vm1, %v6533_v61  ;;  %5798 = vmatprep.mubr.msk.f32.mxu1 %vm320_vm1, %v7990_v53  ;;  %v7994_v61 = vld [vmem:[#allocation23_spill] sm:$0xff] }
  0xe9   : > { %5851 = vmatprep.mubr.msk.f32.mxu0 %vm320_vm1, %v6537_v63  ;;  %v7995_v63 = vld [vmem:[#allocation24_spill] sm:$0xff] }
  0xeb   : > { %5799 = vmatmul.mubr.msk.f32.gmra.mxu1 %vm320_vm1, %v7991_v55 }
  0xec   : > { %5852 = vmatmul.mubr.msk.f32.gmra.mxu0 %vm320_vm1, %v6549_v1  ;;  %5801 = vmatprep.mubr.msk.f32.mxu1 %vm320_vm1, %v7992_v57  ;;  %v7996_v1 = vld [vmem:[#allocation25_spill] sm:$0xff] }
  0xed   : > { %5854 = vmatprep.mubr.msk.f32.mxu0 %vm320_vm1, %v6415_v29  ;;  %v7051_v29 = vpop.f32.mrf.mxu0 }
  0xef   : > { %5802 = vmatmul.mubr.msk.f32.gmra.mxu1 %vm320_vm1, %v7993_v59 }
  0xf0   : > { %5855 = vmatmul.mubr.msk.f32.gmra.mxu0 %vm320_vm1, %v6417_v30  ;;  %5804 = vmatprep.mubr.msk.f32.mxu1 %vm320_vm1, %v7994_v61  ;;  %v7997_v30 = vld [vmem:[#allocation26_spill] sm:$0xff] }
  0xf1   : > { %5857 = vmatprep.mubr.msk.f32.mxu0 %vm320_vm1, %v6428_v32  ;;  %v7057_v32 = vpop.f32.mrf.mxu0 }
  0xf3   : > { %5805 = vmatmul.mubr.msk.f32.gmra.mxu1 %vm320_vm1, %v7995_v63 }
  0xf4   : > { %5858 = vmatmul.mubr.msk.f32.gmra.mxu0 %vm320_vm1, %v6449_v38  ;;  %5807 = vmatprep.mubr.msk.f32.mxu1 %vm320_vm1, %v7996_v1 }
  0xf5   : > { %5860 = vmatprep.mubr.msk.f32.mxu0 %vm320_vm1, %v6457_v40 }
  0xf7   : > { %5808 = vmatmul.mubr.msk.f32.gmra.mxu1 %vm320_vm1, %v7997_v30 }
  0xf8   : > { %5861 = vmatmul.mubr.msk.f32.gmra.mxu0 %vm320_vm1, %v6467_v42  ;;  %5810 = vmatprep.mubr.msk.f32.mxu1 %vm320_vm1, %v7998_v16 }
  0xf9   : > { %5863 = vmatprep.mubr.msk.f32.mxu0 %vm320_vm1, %v6473_v43 }
  0xfb   : > { %v7063_v38 = vpop.f32.mrf.mxu1  ;;  %5811 = vmatmul.mubr.msk.f32.gmra.mxu1 %vm320_vm1, %v7999_v19 }
  0xfc   : > { %v7067_v40 = vpop.f32.mrf.mxu0  ;;  %5864 = vmatmul.mubr.msk.f32.gmra.mxu0 %vm320_vm1, %v6497_v52  ;;  %5813 = vmatprep.mubr.msk.f32.mxu1 %vm320_vm1, %v8000_v21  ;;  %v8002_v52 = vld [vmem:[#allocation31_spill] sm:$0xff] }
  0xfd   : > { %5866 = vmatprep.mubr.msk.f32.mxu0 %vm320_vm1, %v6503_v54  ;;  %v7075_v42 = vpop.f32.mrf.mxu1 }
  0xfe   : > { %v7077_v23 = vpop.f32.mrf.mxu0 }
  0xff   : > { %v7079_v43 = vpop.f32.mrf.mxu1  ;;  %5814 = vmatmul.mubr.msk.f32.gmra.mxu1 %vm320_vm1, %v8001_v25 }
 0x100   : > { %v7083_v27 = vpop.f32.mrf.mxu0  ;;  %5867 = vmatmul.mubr.msk.f32.gmra.mxu0 %vm320_vm1, %v6513_v56  ;;  %5816 = vmatprep.mubr.msk.f32.mxu1 %vm320_vm1, %v8002_v52  ;;  %v8004_v56 = vld [vmem:[#allocation33_spill] sm:$0xff]  ;;  %v8008_v52 = vld [vmem:[#allocation36_spill] sm:$0xff] }
 0x101   : > { %5869 = vmatprep.mubr.msk.f32.mxu0 %vm320_vm1, %v6519_v58  ;;  %v7091_v54 = vpop.f32.mrf.mxu1 }
 0x102   : > { %v7093_v34 = vpop.f32.mrf.mxu0 }
 0x103   : > { %v7095_v37 = vpop.f32.mrf.mxu1  ;;  %5817 = vmatmul.mubr.msk.f32.gmra.mxu1 %vm320_vm1, %v8003_v47 }
 0x104   : > { %v7099_v5 = vpop.f32.mrf.mxu0  ;;  %5870 = vmatmul.mubr.msk.f32.gmra.mxu0 %vm320_vm1, %v6529_v60  ;;  %5819 = vmatprep.mubr.msk.f32.mxu1 %vm320_vm1, %v8004_v56  ;;  %v8006_v60 = vld [vmem:[#allocation35_spill] sm:$0xff] }
 0x105   : > { %5872 = vmatprep.mubr.msk.f32.mxu0 %vm320_vm1, %v6535_v62  ;;  %v7107_v58 = vpop.f32.mrf.mxu1 }
 0x106   : > { %v7109_v15 = vpop.f32.mrf.mxu0 }
 0x107   : > { %v7111_v12 = vpop.f32.mrf.mxu1  ;;  %5820 = vmatmul.mubr.msk.f32.gmra.mxu1 %vm320_vm1, %v8005_v13  ;;  %v3203_v13 = vld [vmem:[#allocation2 + $0x198] sm:$0xff] }
 0x108   : > { %v7115_v14 = vpop.f32.mrf.mxu0  ;;  %5873 = vmatmul.mubr.msk.f32.gmra.mxu0 %vm320_vm1, %v6545_v0  ;;  %5822 = vmatprep.mubr.msk.f32.mxu1 %vm320_vm1, %v8006_v60  ;;  %v8009_v0 = vld [vmem:[#allocation37_spill] sm:$0xff] }
 0x109   : > { %5875 = vmatprep.mubr.msk.f32.mxu0 %vm320_vm1, %v6551_v2  ;;  %v7123_v62 = vpop.f32.mrf.mxu1 }
 0x10a   : > { %v7125_v21 = vpop.f32.mrf.mxu0 }
 0x10b   : > { %v7127_v25 = vpop.f32.mrf.mxu1  ;;  %5823 = vmatmul.mubr.msk.f32.gmra.mxu1 %vm320_vm1, %v8008_v52 }
 0x10c   : > { %8007 = vst [vmem:[#allocation11_spill] sm:$0xff] %v7127_v25  ;;  %v7131_v47 = vpop.f32.mrf.mxu0  ;;  %5876 = vmatmul.mubr.msk.f32.gmra.mxu0 %vm320_vm1, %v6559_v4  ;;  %5825 = vmatprep.mubr.msk.f32.mxu1 %vm320_vm1, %v8009_v0  ;;  %v8013_v4 = vld [vmem:[#allocation39_spill] sm:$0xff] }
 0x10d   : > { %5878 = vmatprep.mubr.msk.f32.mxu0 %vm320_vm1, %v6971_v8  ;;  %v7139_v2 = vpop.f32.mrf.mxu1  ;;  %v3204_v8 = vld [vmem:[#allocation2 + $0x1a0] sm:$0xff] }
 0x10e   : > { %8010 = vst [vmem:[#allocation12_spill] sm:$0xff] %v7139_v2  ;;  %v7141_v56 = vpop.f32.mrf.mxu0  ;;  %v7158_v2 = vld [vmem:[#allocation2 + $0x182] sm:$0xff] }
 0x10f   : > { %v7143_v60 = vpop.f32.mrf.mxu1  ;;  %5826 = vmatmul.mubr.msk.f32.gmra.mxu1 %vm320_vm1, %v8012_v33  ;;  %8015 = vst [vmem:[#allocation15_spill] sm:$0xff] %v7158_v2 }
 0x110   : > { %8011 = vst [vmem:[#allocation13_spill] sm:$0xff] %v7143_v60  ;;  %v7147_v52 = vpop.f32.mrf.mxu0  ;;  %5879 = vmatmul.mubr.msk.f32.gmra.mxu0 %vm320_vm1, %v6979_v7  ;;  %5828 = vmatprep.mubr.msk.f32.mxu1 %vm320_vm1, %v8013_v4  ;;  %v7169_v7 = vld [vmem:[#allocation2 + $0x18a] sm:$0xff] }
 0x111   : > { %5881 = vmatprep.mubr.msk.f32.mxu0 %vm320_vm1, %v3203_v13  ;;  %v7154_v0 = vpop.f32.mrf.mxu1  ;;  %8017 = vst [vmem:[#allocation17_spill] sm:$0xff] %v7169_v7 }
 0x112   : > { %8014 = vst [vmem:[#allocation14_spill] sm:$0xff] %v7154_v0  ;;  %v7156_v31 = vpop.f32.mrf.mxu0 }
 0x113   : > { %v7160_v60 = vpop.f32.mrf.mxu1  ;;  %5829 = vmatmul.mubr.msk.f32.gmra.mxu1 %vm320_vm1, %v6815_v17 }
 0x114   : > { %8016 = vst [vmem:[#allocation16_spill] sm:$0xff] %v7160_v60  ;;  %v7164_v33 = vpop.f32.mrf.mxu0  ;;  %5882 = vmatmul.mubr.msk.f32.gmra.mxu0 %vm320_vm1, %v3204_v8  ;;  %5831 = vmatprep.mubr.msk.f32.mxu1 %vm320_vm1, %v7158_v2 }
 0x115   : > { %5936 = vmatprep.mubr.msk.f32.mxu0 %vm320_vm1, %v7984_v35  ;;  %v7173_v13 = vpop.f32.mrf.mxu1  ;;  %v7190_v35 = vld [vmem:[%s7894_s2] ss:$0 sm:$0xff] }
 0x116   : > { %8018 = vst [vmem:[#allocation18_spill] sm:$0xff] %v7173_v13  ;;  %v7175_v4 = vpop.f32.mrf.mxu0  ;;  %v839_v13 = vadd.f32 %v7051_v29, %v7190_v35 }
 0x117   : > { %v7177_v60 = vpop.f32.mrf.mxu1  ;;  %5832 = vmatmul.mubr.msk.f32.gmra.mxu1 %vm320_vm1, %v7169_v7  ;;  %v841_v7 = vadd.f32 %v7067_v40, %v7190_v35 }
 0x118   : > { %8019 = vst [vmem:[#allocation19_spill] sm:$0xff] %v7177_v60  ;;  %v5638_v17 = vpop.f32.mrf.mxu0  ;;  %5937 = vmatmul.mubr.msk.f32.vlgmr.msra.gmra.mxu0 %vm320_vm1, %v7985_v39  ;;  %5886 = vmatprep.mubr.msk.f32.mxu1 %vm320_vm1, %v6605_v18  ;;  %v838_v18 = vadd.f32 %v7190_v35, %v7057_v32 }
 0x119   : > { %5939 = vmatprep.mubr.msk.f32.mxu0 %vm320_vm1, %v7986_v41  ;;  %v7192_v8 = vpop.f32.mrf.mxu1 }
 0x11a   : > { %8020 = vst [vmem:[#allocation20_spill] sm:$0xff] %v7192_v8  ;;  %v1587_v60 = vpop.f32.mrf.mxu0 }
 0x11b   : > { %v5588_v0 = vpop.f32.mrf.mxu1  ;;  %5887 = vmatmul.mubr.msk.f32.vlgmr.msra.gmra.mxu1 %vm320_vm1, %v6619_v20 }
 0x11c   : > { %v5641_v39 = vpop.f32.mrf.mxu0  ;;  %5940 = vmatmul.mubr.msk.f32.gmra.mxu0 %vm320_vm1, %v7987_v44  ;;  %v1293_v41 = vadd.f32 %v5588_v0, %v839_v13  ;;  %5889 = vmatprep.mubr.msk.f32.mxu1 %vm320_vm1, %v6625_v22  ;;  %v840_v22 = vadd.f32 %v7190_v35, %v7077_v23 }
 0x11d   : > { %5942 = vmatprep.mubr.msk.f32.mxu0 %vm320_vm1, %v7988_v11  ;;  %v1133_v8 = vpop.f32.mrf.mxu1 }
 0x11e   : > { %v1597_v29 = vpop.f32.mrf.mxu0  ;;  %v7208_v20 = vadd.f32 %v5638_v17, %v1293_v41  ;;  %v1292_v2 = vadd.f32 %v1133_v8, %v838_v18 }
 0x11f   : > { %v5591_v25 = vpop.f32.mrf.mxu1  ;;  %5890 = vmatmul.mubr.msk.f32.gmra.mxu1 %vm320_vm1, %v6635_v24  ;;  %v843_v24 = vadd.f32 %v7083_v27, %v7190_v35 }
 0x120   : > { %v5644_v44 = vpop.f32.mrf.mxu0  ;;  %5943 = vmatmul.mubr.msk.f32.gmra.mxu0 %vm320_vm1, %v7989_v45  ;;  %v7216_v11 = vadd.f32 %v1587_v60, %v1292_v2  ;;  %v1295_v32 = vadd.f32 %v5591_v25, %v841_v7  ;;  %5892 = vmatprep.mubr.msk.f32.mxu1 %vm320_vm1, %v6641_v26  ;;  %v842_v26 = vadd.f32 %v7190_v35, %v7093_v34 }
 0x121   : > { %5945 = vmatprep.mubr.msk.f32.mxu0 %vm320_vm1, %v7990_v53  ;;  %v1143_v40 = vpop.f32.mrf.mxu1 }
 0x122   : > { %v1607_v0 = vpop.f32.mrf.mxu0  ;;  %v7224_v13 = vadd.f32 %v5641_v39, %v1295_v32  ;;  %v1294_v45 = vadd.f32 %v1143_v40, %v840_v22 }
 0x123   : > { %v5594_v17 = vpop.f32.mrf.mxu1  ;;  %5893 = vmatmul.mubr.msk.f32.gmra.mxu1 %vm320_vm1, %v6651_v28  ;;  %v845_v28 = vadd.f32 %v7099_v5, %v7190_v35 }
 0x124   : > { %v5647_v23 = vpop.f32.mrf.mxu0  ;;  %5946 = vmatmul.mubr.msk.f32.gmra.mxu0 %vm320_vm1, %v7991_v55  ;;  %v7232_v53 = vadd.f32 %v1597_v29, %v1294_v45  ;;  %v1297_v25 = vadd.f32 %v5594_v17, %v843_v24  ;;  %5895 = vmatprep.mubr.msk.f32.mxu1 %vm320_vm1, %v6657_v36  ;;  %v844_v36 = vadd.f32 %v7190_v35, %v7109_v15  ;;  %v4097_v24 = vld [vmem:[#allocation2 + $0xf2] sm:$0xff] }
 0x125   : > { %5948 = vmatprep.mubr.msk.f32.mxu0 %vm320_vm1, %v7992_v57  ;;  %v1153_v27 = vpop.f32.mrf.mxu1 }
 0x126   : > { %v1617_v2 = vpop.f32.mrf.mxu0  ;;  %v7240_v60 = vadd.f32 %v5644_v44, %v1297_v25  ;;  %v1296_v55 = vadd.f32 %v1153_v27, %v842_v26  ;;  %v3643_v27 = vld [vmem:[#allocation2 + $0xf1] sm:$0xff] }
 0x127   : > { %v5597_v7 = vpop.f32.mrf.mxu1  ;;  %5896 = vmatmul.mubr.msk.f32.gmra.mxu1 %vm320_vm1, %v6667_v46  ;;  %v847_v46 = vadd.f32 %v7115_v14, %v7190_v35 }
 0x128   : > { %v5650_v34 = vpop.f32.mrf.mxu0  ;;  %5949 = vmatmul.mubr.msk.f32.gmra.mxu0 %vm320_vm1, %v7993_v59  ;;  %v7248_v57 = vadd.f32 %v1607_v0, %v1296_v55  ;;  %v1299_v8 = vadd.f32 %v5597_v7, %v845_v28  ;;  %5898 = vmatprep.mubr.msk.f32.mxu1 %vm320_vm1, %v6673_v48  ;;  %v846_v48 = vadd.f32 %v7190_v35, %v7125_v21 }
 0x129   : > { %5951 = vmatprep.mubr.msk.f32.mxu0 %vm320_vm1, %v7994_v61  ;;  %v1163_v5 = vpop.f32.mrf.mxu1 }
 0x12a   : > { %v1627_v39 = vpop.f32.mrf.mxu0  ;;  %v7256_v18 = vadd.f32 %v5647_v23, %v1299_v8  ;;  %v1298_v59 = vadd.f32 %v1163_v5, %v844_v36  ;;  %v3644_v36 = vld [vmem:[#allocation2 + $0xf9] sm:$0xff] }
 0x12b   : > { %v5600_v41 = vpop.f32.mrf.mxu1  ;;  %5899 = vmatmul.mubr.msk.f32.gmra.mxu1 %vm320_vm1, %v6683_v50  ;;  %v849_v50 = vadd.f32 %v7131_v47, %v7190_v35 }
 0x12c   : > { %v5653_v15 = vpop.f32.mrf.mxu0  ;;  %5952 = vmatmul.mubr.msk.f32.gmra.mxu0 %vm320_vm1, %v7995_v63  ;;  %v7264_v61 = vadd.f32 %v1617_v2, %v1298_v59  ;;  %v1301_v29 = vadd.f32 %v5600_v41, %v847_v46  ;;  %5901 = vmatprep.mubr.msk.f32.mxu1 %vm320_vm1, %v6689_v3  ;;  %v848_v3 = vadd.f32 %v7190_v35, %v7141_v56  ;;  %v4101_v46 = vld [vmem:[#allocation2 + $0x122] sm:$0xff] }
 0x12d   : > { %5954 = vmatprep.mubr.msk.f32.mxu0 %vm320_vm1, %v7996_v1  ;;  %v1173_v14 = vpop.f32.mrf.mxu1  ;;  %v853_v2 = vadd.f32 %v7164_v33, %v7190_v35  ;;  %v4100_v33 = vld [vmem:[#allocation2 + $0x112] sm:$0xff] }
 0x12e   : > { %v1637_v44 = vpop.f32.mrf.mxu0  ;;  %v7272_v22 = vadd.f32 %v5650_v34, %v1301_v29  ;;  %v1300_v63 = vadd.f32 %v1173_v14, %v846_v48  ;;  %v854_v48 = vadd.f32 %v7190_v35, %v7075_v42 }
 0x12f   : > { %v5603_v32 = vpop.f32.mrf.mxu1  ;;  %5902 = vmatmul.mubr.msk.f32.gmra.mxu1 %vm320_vm1, %v6699_v6  ;;  %v851_v6 = vadd.f32 %v7147_v52, %v7190_v35  ;;  %v4098_v52 = vld [vmem:[#allocation2 + $0xfa] sm:$0xff] }
 0x130   : > { %v5656_v21 = vpop.f32.mrf.mxu0  ;;  %5955 = vmatmul.mubr.msk.f32.gmra.mxu0 %vm320_vm1, %v7997_v30  ;;  %v7280_v1 = vadd.f32 %v1627_v39, %v1300_v63  ;;  %v1303_v40 = vadd.f32 %v5603_v32, %v849_v50  ;;  %5904 = vmatprep.mubr.msk.f32.mxu1 %vm320_vm1, %v6705_v10  ;;  %v850_v10 = vadd.f32 %v7190_v35, %v7156_v31  ;;  %v3645_v39 = vld [vmem:[#allocation2 + $0x109] sm:$0xff]  ;;  %v3647_v32 = vld [vmem:[#allocation2 + $0x121] sm:$0xff] }
 0x131   : > { %5957 = vmatprep.mubr.msk.f32.mxu0 %vm320_vm1, %v7998_v16  ;;  %v1183_v47 = vpop.f32.mrf.mxu1 }
 0x132   : > { %v1647_v0 = vpop.f32.mrf.mxu0  ;;  %v7288_v45 = vadd.f32 %v5653_v15, %v1303_v40  ;;  %v1302_v30 = vadd.f32 %v1183_v47, %v848_v3  ;;  %v857_v3 = vadd.f32 %v7079_v43, %v7190_v35  ;;  %v4104_v43 = vld [vmem:[#allocation2 + $0x142] sm:$0xff] }
 0x133   : > { %v5606_v17 = vpop.f32.mrf.mxu1  ;;  %5905 = vmatmul.mubr.msk.f32.gmra.mxu1 %vm320_vm1, %v6715_v51  ;;  %v4099_v51 = vld [vmem:[#allocation2 + $0x10a] sm:$0xff] }
 0x134   : > { %v5659_v56 = vpop.f32.mrf.mxu0  ;;  %5958 = vmatmul.mubr.msk.f32.gmra.mxu0 %vm320_vm1, %v7999_v19  ;;  %v7296_v16 = vadd.f32 %v1637_v44, %v1302_v30  ;;  %v1305_v23 = vadd.f32 %v5606_v17, %v851_v6  ;;  %5907 = vmatprep.mubr.msk.f32.mxu1 %vm320_vm1, %v6721_v49  ;;  %v852_v49 = vadd.f32 %v7190_v35, %v7175_v4  ;;  %v3646_v44 = vld [vmem:[#allocation2 + $0x111] sm:$0xff]  ;;  %v3648_v17 = vld [vmem:[#allocation2 + $0x129] sm:$0xff] }
 0x135   : > { %5960 = vmatprep.mubr.msk.f32.mxu0 %vm320_vm1, %v4097_v24  ;;  %v1193_v26 = vpop.f32.mrf.mxu1  ;;  %v856_v24 = vadd.f32 %v7190_v35, %v7091_v54 }
 0x136   : > { %v1657_v25 = vpop.f32.mrf.mxu0  ;;  %v7303_v19 = vadd.f32 %v5656_v21, %v1305_v23  ;;  %v1304_v28 = vadd.f32 %v1193_v26, %v850_v10  ;;  %v4103_v21 = vld [vmem:[#allocation2 + $0x13a] sm:$0xff]  ;;  %v859_v26 = vadd.f32 %v7095_v37, %v7190_v35 }
 0x137   : > { %v5609_v31 = vpop.f32.mrf.mxu1  ;;  %5908 = vmatmul.mubr.msk.f32.gmra.mxu1 %vm320_vm1, %v6731_v9  ;;  %v855_v9 = vadd.f32 %v7063_v38, %v7190_v35  ;;  %v4102_v38 = vld [vmem:[#allocation2 + $0x12a] sm:$0xff]  ;;  %v3649_v23 = vld [vmem:[#allocation2 + $0x139] sm:$0xff] }
 0x138   : > { %v5662_v55 = vpop.f32.mrf.mxu0  ;;  %5961 = vmatmul.mubr.msk.f32.gmra.mxu0 %vm320_vm1, %v4098_v52  ;;  %v7310_v7 = vadd.f32 %v1647_v0, %v1304_v28  ;;  %v1307_v34 = vadd.f32 %v5609_v31, %v853_v2  ;;  %5910 = vmatprep.mubr.msk.f32.mxu1 %vm320_vm1, %v3643_v27  ;;  %v4105_v52 = vld [vmem:[#allocation2 + $0x152] sm:$0xff]  ;;  %v858_v2 = vadd.f32 %v7190_v35, %v7107_v58  ;;  %v4106_v37 = vld [vmem:[#allocation2 + $0x15a] sm:$0xff] }
 0x139   : > { %5963 = vmatprep.mubr.msk.f32.mxu0 %vm320_vm1, %v4099_v51  ;;  %v1203_v8 = vpop.f32.mrf.mxu1 }
 0x13a   : > { %v1667_v5 = vpop.f32.mrf.mxu0  ;;  %v7316_v59 = vadd.f32 %v5659_v56, %v1307_v34  ;;  %v1306_v41 = vadd.f32 %v1203_v8, %v852_v49  ;;  %v861_v8 = vadd.f32 %v7111_v12, %v7190_v35  ;;  %v4108_v12 = vld [vmem:[#allocation2 + $0x172] sm:$0xff] }
 0x13b   : > { %v5612_v4 = vpop.f32.mrf.mxu1  ;;  %5911 = vmatmul.mubr.msk.f32.gmra.mxu1 %vm320_vm1, %v3644_v36  ;;  %v3651_v36 = vld [vmem:[#allocation2 + $0x151] sm:$0xff] }
 0x13c   : > { %v5665_v15 = vpop.f32.mrf.mxu0  ;;  %5964 = vmatmul.mubr.msk.f32.gmra.mxu0 %vm320_vm1, %v4100_v33  ;;  %v7322_v29 = vadd.f32 %v1657_v25, %v1306_v41  ;;  %v1309_v14 = vadd.f32 %v5612_v4, %v855_v9  ;;  %5913 = vmatprep.mubr.msk.f32.mxu1 %vm320_vm1, %v3645_v39  ;;  %v4107_v33 = vld [vmem:[#allocation2 + $0x16a] sm:$0xff]  ;;  %v860_v9 = vadd.f32 %v7190_v35, %v7123_v62 }
 0x13d   : > { %5966 = vmatprep.mubr.msk.f32.mxu0 %vm320_vm1, %v4101_v46  ;;  %v1213_v50 = vpop.f32.mrf.mxu1 }
 0x13e   : > { %v1677_v63 = vpop.f32.mrf.mxu0  ;;  %v7328_v40 = vadd.f32 %v5662_v55, %v1309_v14  ;;  %v1308_v47 = vadd.f32 %v1213_v50, %v854_v48  ;;  %v3650_v55 = vld [vmem:[#allocation2 + $0x141] sm:$0xff] }
 0x13f   : > { %v5615_v42 = vpop.f32.mrf.mxu1  ;;  %5914 = vmatmul.mubr.msk.f32.gmra.mxu1 %vm320_vm1, %v3646_v44  ;;  %v3653_v44 = vld [vmem:[#allocation2 + $0x169] sm:$0xff] }
 0x140   : > { %v5668_v0 = vpop.f32.mrf.mxu0  ;;  %5967 = vmatmul.mubr.msk.f32.gmra.mxu0 %vm320_vm1, %v4102_v38  ;;  %v7334_v6 = vadd.f32 %v1667_v5, %v1308_v47  ;;  %v1311_v30 = vadd.f32 %v5615_v42, %v857_v3  ;;  %5916 = vmatprep.mubr.msk.f32.mxu1 %vm320_vm1, %v3647_v32  ;;  %v8021_v38 = vld [vmem:[#allocation11_spill] sm:$0xff]  ;;  %v8022_v3 = vld [vmem:[#allocation12_spill] sm:$0xff] }
 0x141   : > { %5969 = vmatprep.mubr.msk.f32.mxu0 %vm320_vm1, %v4103_v21  ;;  %v1223_v56 = vpop.f32.mrf.mxu1  ;;  %v863_v50 = vadd.f32 %v8021_v38, %v7190_v35  ;;  %v862_v47 = vadd.f32 %v7190_v35, %v8022_v3 }
 0x142   : > { %v1687_v10 = vpop.f32.mrf.mxu0  ;;  %v7340_v25 = vadd.f32 %v5665_v15, %v1311_v30  ;;  %v1310_v27 = vadd.f32 %v1223_v56, %v856_v24  ;;  %v3652_v15 = vld [vmem:[#allocation2 + $0x159] sm:$0xff]  ;;  %v3654_v24 = vld [vmem:[#allocation2 + $0x171] sm:$0xff] }
 0x143   : > { %v5618_v54 = vpop.f32.mrf.mxu1  ;;  %5917 = vmatmul.mubr.msk.f32.gmra.mxu1 %vm320_vm1, %v3648_v17  ;;  %v8023_v30 = vld [vmem:[#allocation15_spill] sm:$0xff] }
 0x144   : > { %v5671_v51 = vpop.f32.mrf.mxu0  ;;  %5970 = vmatmul.mubr.msk.f32.gmra.mxu0 %vm320_vm1, %v4104_v43  ;;  %v7346_v28 = vadd.f32 %v1677_v63, %v1310_v27  ;;  %v1313_v31 = vadd.f32 %v5618_v54, %v859_v26  ;;  %5919 = vmatprep.mubr.msk.f32.mxu1 %vm320_vm1, %v3649_v23  ;;  %v4111_v56 = vld [vmem:[#allocation2 + $0x19a] sm:$0xff] }
 0x145   : > { %5972 = vmatprep.mubr.msk.f32.mxu0 %vm320_vm1, %v4105_v52  ;;  %v1233_v49 = vpop.f32.mrf.mxu1 }
 0x146   : > { %v1697_v34 = vpop.f32.mrf.mxu0  ;;  %v7352_v5 = vadd.f32 %v5668_v0, %v1313_v31  ;;  %v1312_v39 = vadd.f32 %v1233_v49, %v858_v2  ;;  %v8026_v2 = vld [vmem:[#allocation14_spill] sm:$0xff]  ;;  %v8027_v49 = vld [vmem:[#allocation40_spill] sm:$0xff] }
 0x147   : > { %v5621_v58 = vpop.f32.mrf.mxu1  ;;  %5920 = vmatmul.mubr.msk.f32.gmra.mxu1 %vm320_vm1, %v3650_v55  ;;  %v864_v31 = vadd.f32 %v7190_v35, %v8026_v2 }
 0x148   : > { %v5674_v46 = vpop.f32.mrf.mxu0  ;;  %5973 = vmatmul.mubr.msk.f32.gmra.mxu0 %vm320_vm1, %v4106_v37  ;;  %v7358_v41 = vadd.f32 %v1687_v10, %v1312_v39  ;;  %v1315_v4 = vadd.f32 %v5621_v58, %v861_v8  ;;  %5922 = vmatprep.mubr.msk.f32.mxu1 %vm320_vm1, %v3651_v36  ;;  %v8024_v10 = vld [vmem:[#allocation13_spill] sm:$0xff]  ;;  %v3657_v8 = vld [vmem:[#allocation2 + $0x199] sm:$0xff] }
 0x149   : > { %5975 = vmatprep.mubr.msk.f32.mxu0 %vm320_vm1, %v4107_v33  ;;  %v1243_v48 = vpop.f32.mrf.mxu1  ;;  %v865_v23 = vadd.f32 %v8024_v10, %v7190_v35  ;;  %v8028_v39 = vld [vmem:[#allocation16_spill] sm:$0xff] }
 0x14a   : > { %v1707_v14 = vpop.f32.mrf.mxu0  ;;  %v7364_v63 = vadd.f32 %v5671_v51, %v1315_v4  ;;  %v1314_v32 = vadd.f32 %v1243_v48, %v860_v9  ;;  %v8025_v51 = vld [vmem:[#allocation17_spill] sm:$0xff]  ;;  %v867_v58 = vadd.f32 %v8028_v39, %v7190_v35  ;;  %v8030_v48 = vld [vmem:[#allocation18_spill] sm:$0xff] }
 0x14b   : > { %v5624_v21 = vpop.f32.mrf.mxu1  ;;  %5923 = vmatmul.mubr.msk.f32.gmra.mxu1 %vm320_vm1, %v3652_v15  ;;  %v8029_v15 = vld [vmem:[#allocation41_spill] sm:$0xff] }
 0x14c   : > { %v5677_v62 = vpop.f32.mrf.mxu0  ;;  %5976 = vmatmul.mubr.msk.f32.gmra.mxu0 %vm320_vm1, %v4108_v12  ;;  %v7370_v42 = vadd.f32 %v1697_v34, %v1314_v32  ;;  %v1317_v0 = vadd.f32 %v5624_v21, %v863_v50  ;;  %5925 = vmatprep.mubr.msk.f32.mxu1 %vm320_vm1, %v3653_v44  ;;  %v4112_v34 = vld [vmem:[#allocation2 + $0x1a2] sm:$0xff] }
 0x14d   : > { %5978 = vmatprep.mubr.msk.f32.mxu0 %vm320_vm1, %v8023_v30  ;;  %v1253_v17 = vpop.f32.mrf.mxu1  ;;  %v3658_v50 = vld [vmem:[#allocation2 + $0x1a1] sm:$0xff] }
 0x14e   : > { %v1717_v43 = vpop.f32.mrf.mxu0  ;;  %v7377_v52 = vadd.f32 %v5674_v46, %v1317_v0  ;;  %v1316_v26 = vadd.f32 %v1253_v17, %v862_v47  ;;  %v8032_v17 = vld [vmem:[#allocation20_spill] sm:$0xff] }
 0x14f   : > { %v5627_v27 = vpop.f32.mrf.mxu1  ;;  %5926 = vmatmul.mubr.msk.f32.gmra.mxu1 %vm320_vm1, %v3654_v24 }
 0x150   : > { %v5680_v54 = vpop.f32.mrf.mxu0  ;;  %5979 = vmatmul.mubr.msk.f32.gmra.mxu0 %vm320_vm1, %v8025_v51  ;;  %v7384_v55 = vadd.f32 %v1707_v14, %v1316_v26  ;;  %v1319_v37 = vadd.f32 %v5627_v27, %v865_v23  ;;  %5928 = vmatprep.mubr.msk.f32.mxu1 %vm320_vm1, %v8027_v49  ;;  %v866_v14 = vadd.f32 %v7190_v35, %v8030_v48 }
 0x151   : > { %5981 = vmatprep.mubr.msk.f32.mxu0 %vm320_vm1, %v4111_v56  ;;  %v1263_v36 = vpop.f32.mrf.mxu1 }
 0x152   : > { %v1727_v33 = vpop.f32.mrf.mxu0  ;;  %v7391_v46 = vadd.f32 %v5677_v62, %v1319_v37  ;;  %v1318_v9 = vadd.f32 %v1263_v36, %v864_v31  ;;  %v8031_v62 = vld [vmem:[#allocation19_spill] sm:$0xff] }
 0x153   : > { %v5630_v4 = vpop.f32.mrf.mxu1  ;;  %5929 = vmatmul.mubr.msk.f32.gmra.mxu1 %vm320_vm1, %v8029_v15  ;;  %v869_v3 = vadd.f32 %v8031_v62, %v7190_v35 }
 0x154   : > { %v5683_v12 = vpop.f32.mrf.mxu0  ;;  %5982 = vmatmul.mubr.msk.f32.gmra.mxu0 %vm320_vm1, %v4112_v34  ;;  %v7398_v44 = vadd.f32 %v1717_v43, %v1318_v9  ;;  %v1321_v38 = vadd.f32 %v5630_v4, %v867_v58  ;;  %5931 = vmatprep.mubr.msk.f32.mxu1 %vm320_vm1, %v3657_v8  ;;  %v868_v43 = vadd.f32 %v7190_v35, %v8032_v17 }
 0x155   : > { %v1273_v32 = vpop.f32.mrf.mxu1 }
 0x156   : > { %v1737_v21 = vpop.f32.mrf.mxu0  ;;  %v7403_v47 = vadd.f32 %v5680_v54, %v1321_v38  ;;  %v1320_v0 = vadd.f32 %v1273_v32, %v866_v14 }
 0x157   : > { %v5633_v24 = vpop.f32.mrf.mxu1  ;;  %5932 = vmatmul.mubr.msk.f32.gmra.mxu1 %vm320_vm1, %v3658_v50 }
 0x158   : > { %v5738_v30 = vpop.f32.mrf.mxu0  ;;  %v7408_v56 = vadd.f32 %v1727_v33, %v1320_v0  ;;  %v1323_v10 = vadd.f32 %v5633_v24, %v869_v3 }
 0x159   : > { %v1283_v23 = vpop.f32.mrf.mxu1 }
 0x15a   : > { %v2495_v26 = vpop.f32.mrf.mxu0  ;;  %v7410_v27 = vadd.f32 %v5683_v12, %v1323_v10  ;;  %v1322_v51 = vadd.f32 %v1283_v23, %v868_v43 }
 0x15b   : > { %v5688_v2 = vpop.f32.mrf.mxu1 }
 0x15c   : > { %v5741_v31 = vpop.f32.mrf.mxu0  ;;  %v7412_v54 = vadd.f32 %v1737_v21, %v1322_v51  ;;  %v2201_v37 = vadd.f32 %v5688_v2, %v7208_v20 }
 0x15d   : > { %v2041_v49 = vpop.f32.mrf.mxu1 }
 0x15e   : > { %v2505_v34 = vpop.f32.mrf.mxu0  ;;  %v7415_v36 = vadd.f32 %v5738_v30, %v2201_v37  ;;  %v2200_v35 = vadd.f32 %v2041_v49, %v7216_v11 }
 0x15f   : > { %v5691_v33 = vpop.f32.mrf.mxu1 }
 0x160   : > { %v5744_v8 = vpop.f32.mrf.mxu0  ;;  %v7418_v39 = vadd.f32 %v2495_v26, %v2200_v35  ;;  %v2203_v58 = vadd.f32 %v5691_v33, %v7224_v13 }
 0x161   : > { %v2051_v9 = vpop.f32.mrf.mxu1 }
 0x162   : > { %v2515_v4 = vpop.f32.mrf.mxu0  ;;  %v7421_v15 = vadd.f32 %v5741_v31, %v2203_v58  ;;  %v2202_v12 = vadd.f32 %v2051_v9, %v7232_v53 }
 0x163   : > { %v5694_v48 = vpop.f32.mrf.mxu1 }
 0x164   : > { %v5747_v20 = vpop.f32.mrf.mxu0  ;;  %v7424_v14 = vadd.f32 %v2505_v34, %v2202_v12  ;;  %v2205_v38 = vadd.f32 %v5694_v48, %v7240_v60 }
 0x165   : > { %v2061_v50 = vpop.f32.mrf.mxu1 }
 0x166   : > { %v2525_v11 = vpop.f32.mrf.mxu0  ;;  %v7427_v32 = vadd.f32 %v5744_v8, %v2205_v38  ;;  %v2204_v21 = vadd.f32 %v2061_v50, %v7248_v57 }
 0x167   : > { %v5697_v62 = vpop.f32.mrf.mxu1 }
 0x168   : > { %v5750_v13 = vpop.f32.mrf.mxu0  ;;  %v7430_v3 = vadd.f32 %v2515_v4, %v2204_v21  ;;  %v2207_v0 = vadd.f32 %v5697_v62, %v7256_v18 }
 0x169   : > { %v2071_v24 = vpop.f32.mrf.mxu1 }
 0x16a   : > { %v2535_v53 = vpop.f32.mrf.mxu0  ;;  %v7433_v30 = vadd.f32 %v5747_v20, %v2207_v0  ;;  %v2206_v17 = vadd.f32 %v2071_v24, %v7264_v61 }
 0x16b   : > { %v5700_v43 = vpop.f32.mrf.mxu1 }
 0x16c   : > { %v5753_v60 = vpop.f32.mrf.mxu0  ;;  %v7436_v10 = vadd.f32 %v2525_v11, %v2206_v17  ;;  %v2209_v23 = vadd.f32 %v5700_v43, %v7272_v22 }
 0x16d   : > { %v2081_v26 = vpop.f32.mrf.mxu1 }
 0x16e   : > { %v2545_v57 = vpop.f32.mrf.mxu0  ;;  %v7439_v51 = vadd.f32 %v5750_v13, %v2209_v23  ;;  %v2208_v2 = vadd.f32 %v2081_v26, %v7280_v1 }
 0x16f   : > { %v5703_v31 = vpop.f32.mrf.mxu1 }
 0x170   : > { %v5756_v18 = vpop.f32.mrf.mxu0  ;;  %v7442_v37 = vadd.f32 %v2535_v53, %v2208_v2  ;;  %v2211_v49 = vadd.f32 %v5703_v31, %v7288_v45 }
 0x171   : > { %v2091_v34 = vpop.f32.mrf.mxu1 }
 0x172   : > { %v2555_v61 = vpop.f32.mrf.mxu0  ;;  %v7445_v35 = vadd.f32 %v5753_v60, %v2211_v49  ;;  %v2210_v33 = vadd.f32 %v2091_v34, %v7296_v16 }
 0x173   : > { %v5706_v8 = vpop.f32.mrf.mxu1 }
 0x174   : > { %v5759_v22 = vpop.f32.mrf.mxu0  ;;  %v7448_v58 = vadd.f32 %v2545_v57, %v2210_v33  ;;  %v2213_v9 = vadd.f32 %v5706_v8, %v7303_v19 }
 0x175   : > { %v2101_v4 = vpop.f32.mrf.mxu1 }
 0x176   : > { %v2565_v1 = vpop.f32.mrf.mxu0  ;;  %v7451_v12 = vadd.f32 %v5756_v18, %v2213_v9  ;;  %v2212_v48 = vadd.f32 %v2101_v4, %v7310_v7 }
 0x177   : > { %v5709_v20 = vpop.f32.mrf.mxu1 }
 0x178   : > { %v5762_v45 = vpop.f32.mrf.mxu0  ;;  %v7454_v38 = vadd.f32 %v2555_v61, %v2212_v48  ;;  %v2215_v50 = vadd.f32 %v5709_v20, %v7316_v59 }
 0x179   : > { %v2111_v11 = vpop.f32.mrf.mxu1 }
 0x17a   : > { %v2575_v16 = vpop.f32.mrf.mxu0  ;;  %v7457_v21 = vadd.f32 %v5759_v22, %v2215_v50  ;;  %v2214_v62 = vadd.f32 %v2111_v11, %v7322_v29 }
 0x17b   : > { %v5712_v13 = vpop.f32.mrf.mxu1 }
 0x17c   : > { %v5765_v19 = vpop.f32.mrf.mxu0  ;;  %v7460_v0 = vadd.f32 %v2565_v1, %v2214_v62  ;;  %v2217_v24 = vadd.f32 %v5712_v13, %v7328_v40 }
 0x17d   : > { %v2121_v53 = vpop.f32.mrf.mxu1 }
 0x17e   : > { %v2585_v7 = vpop.f32.mrf.mxu0  ;;  %v7463_v17 = vadd.f32 %v5762_v45, %v2217_v24  ;;  %v2216_v43 = vadd.f32 %v2121_v53, %v7334_v6 }
 0x17f   : > { %v5715_v60 = vpop.f32.mrf.mxu1 }
 0x180   : > { %v5768_v59 = vpop.f32.mrf.mxu0  ;;  %v7466_v23 = vadd.f32 %v2575_v16, %v2216_v43  ;;  %v2219_v26 = vadd.f32 %v5715_v60, %v7340_v25 }
 0x181   : > { %v2131_v57 = vpop.f32.mrf.mxu1 }
 0x182   : > { %v2595_v29 = vpop.f32.mrf.mxu0  ;;  %v7469_v2 = vadd.f32 %v5765_v19, %v2219_v26  ;;  %v2218_v31 = vadd.f32 %v2131_v57, %v7346_v28 }
 0x183   : > { %v5718_v18 = vpop.f32.mrf.mxu1 }
 0x184   : > { %8033 = vst [vmem:[#allocation21_spill] sm:$0xff] %v7469_v2  ;;  %v5771_v40 = vpop.f32.mrf.mxu0  ;;  %v7472_v49 = vadd.f32 %v2585_v7, %v2218_v31  ;;  %v2221_v34 = vadd.f32 %v5718_v18, %v7352_v5 }
 0x185   : > { %v2141_v61 = vpop.f32.mrf.mxu1 }
 0x186   : > { %8034 = vst [vmem:[#allocation22_spill] sm:$0xff] %v7472_v49  ;;  %v2605_v6 = vpop.f32.mrf.mxu0  ;;  %v7475_v33 = vadd.f32 %v5768_v59, %v2221_v34  ;;  %v2220_v8 = vadd.f32 %v2141_v61, %v7358_v41 }
 0x187   : > { %v5721_v22 = vpop.f32.mrf.mxu1 }
 0x188   : > { %8035 = vst [vmem:[#allocation23_spill] sm:$0xff] %v7475_v33  ;;  %v5774_v25 = vpop.f32.mrf.mxu0  ;;  %v7478_v9 = vadd.f32 %v2595_v29, %v2220_v8  ;;  %v2223_v4 = vadd.f32 %v5721_v22, %v7364_v63 }
 0x189   : > { %v2151_v1 = vpop.f32.mrf.mxu1 }
 0x18a   : > { %8036 = vst [vmem:[#allocation24_spill] sm:$0xff] %v7478_v9  ;;  %v2615_v28 = vpop.f32.mrf.mxu0  ;;  %v7481_v48 = vadd.f32 %v5771_v40, %v2223_v4  ;;  %v2222_v20 = vadd.f32 %v2151_v1, %v7370_v42 }
 0x18b   : > { %v5724_v45 = vpop.f32.mrf.mxu1 }
 0x18c   : > { %8037 = vst [vmem:[#allocation25_spill] sm:$0xff] %v7481_v48  ;;  %v5777_v5 = vpop.f32.mrf.mxu0  ;;  %v7484_v50 = vadd.f32 %v2605_v6, %v2222_v20  ;;  %v2225_v11 = vadd.f32 %v5724_v45, %v7377_v52 }
 0x18d   : > { %v2161_v16 = vpop.f32.mrf.mxu1 }
 0x18e   : > { %8038 = vst [vmem:[#allocation26_spill] sm:$0xff] %v7484_v50  ;;  %v2625_v41 = vpop.f32.mrf.mxu0  ;;  %v7487_v62 = vadd.f32 %v5774_v25, %v2225_v11  ;;  %v2224_v13 = vadd.f32 %v2161_v16, %v7384_v55 }
 0x18f   : > { %v5727_v19 = vpop.f32.mrf.mxu1 }
 0x190   : > { %8039 = vst [vmem:[#allocation27_spill] sm:$0xff] %v7487_v62  ;;  %v5780_v63 = vpop.f32.mrf.mxu0  ;;  %v7490_v24 = vadd.f32 %v2615_v28, %v2224_v13  ;;  %v2227_v53 = vadd.f32 %v5727_v19, %v7391_v46 }
 0x191   : > { %v2171_v7 = vpop.f32.mrf.mxu1 }
 0x192   : > { %8040 = vst [vmem:[#allocation28_spill] sm:$0xff] %v7490_v24  ;;  %v2635_v42 = vpop.f32.mrf.mxu0  ;;  %v7493_v43 = vadd.f32 %v5777_v5, %v2227_v53  ;;  %v2226_v60 = vadd.f32 %v2171_v7, %v7398_v44 }
 0x193   : > { %v5730_v59 = vpop.f32.mrf.mxu1 }
 0x194   : > { %8041 = vst [vmem:[#allocation29_spill] sm:$0xff] %v7493_v43  ;;  %v5783_v52 = vpop.f32.mrf.mxu0  ;;  %v7496_v26 = vadd.f32 %v2625_v41, %v2226_v60  ;;  %v2229_v57 = vadd.f32 %v5730_v59, %v7403_v47 }
 0x195   : > { %v2181_v29 = vpop.f32.mrf.mxu1 }
 0x196   : > { %8042 = vst [vmem:[#allocation30_spill] sm:$0xff] %v7496_v26  ;;  %v2645_v55 = vpop.f32.mrf.mxu0  ;;  %v7499_v31 = vadd.f32 %v5780_v63, %v2229_v57  ;;  %v2228_v18 = vadd.f32 %v2181_v29, %v7408_v56 }
 0x197   : > { %v5733_v40 = vpop.f32.mrf.mxu1 }
 0x198   : > { %8043 = vst [vmem:[#allocation31_spill] sm:$0xff] %v7499_v31  ;;  %v7502_v46 = vpop.f32.mrf.mxu0  ;;  %v7504_v34 = vadd.f32 %v2635_v42, %v2228_v18  ;;  %v2231_v61 = vadd.f32 %v5733_v40, %v7410_v27 }
 0x199   : > { %v2191_v44 = vpop.f32.mrf.mxu1 }
 0x19a   : > { %8044 = vst [vmem:[#allocation32_spill] sm:$0xff] %v7504_v34  ;;  %v7507_v6 = vpop.f32.mrf.mxu0  ;;  %v7509_v8 = vadd.f32 %v5783_v52, %v2231_v61  ;;  %v2230_v47 = vadd.f32 %v2191_v44, %v7412_v54 }
 0x19b   : > { %v5788_v22 = vpop.f32.mrf.mxu1 }
 0x19c   : > { %8045 = vst [vmem:[#allocation33_spill] sm:$0xff] %v7509_v8  ;;  %v7512_v25 = vpop.f32.mrf.mxu0  ;;  %v7514_v4 = vadd.f32 %v2645_v55, %v2230_v47 }
 0x19d   : > { %v2949_v56 = vpop.f32.mrf.mxu1 }
 0x19e   : > { %8046 = vst [vmem:[#allocation34_spill] sm:$0xff] %v7514_v4  ;;  %v7516_v1 = vpop.f32.mrf.mxu0 }
 0x19f   : > { %v7518_v28 = vpop.f32.mrf.mxu1 }
 0x1a0   : > { %v7520_v20 = vpop.f32.mrf.mxu0 }
 0x1a1   : > { %v7522_v27 = vpop.f32.mrf.mxu1 }
 0x1a2   : > { %v7524_v45 = vpop.f32.mrf.mxu0 }
 0x1a3   : > { %v7526_v5 = vpop.f32.mrf.mxu1 }
 0x1a4   : > { %v7528_v11 = vpop.f32.mrf.mxu0 }
 0x1a5   : > { %v7530_v54 = vpop.f32.mrf.mxu1 }
 0x1a6   : > { %v7532_v16 = vpop.f32.mrf.mxu0 }
 0x1a7   : > { %v7534_v41 = vpop.f32.mrf.mxu1 }
 0x1a8   : > { %v7536_v13 = vpop.f32.mrf.mxu0 }
 0x1a9   : > { %v7538_v19 = vpop.f32.mrf.mxu1 }
 0x1aa   : > { %v7540_v63 = vpop.f32.mrf.mxu0 }
 0x1ab   : > { %v7542_v53 = vpop.f32.mrf.mxu1 }
 0x1ac   : > { %v7544_v7 = vpop.f32.mrf.mxu0 }
 0x1ad   : > { %v7546_v42 = vpop.f32.mrf.mxu1 }
 0x1ae   : > { %v7548_v60 = vpop.f32.mrf.mxu0 }
 0x1af   : > { %v7550_v59 = vpop.f32.mrf.mxu1 }
 0x1b0   : > { %v7552_v52 = vpop.f32.mrf.mxu0 }
 0x1b1   : > { %v7554_v57 = vpop.f32.mrf.mxu1 }
 0x1b2   : > { %v7556_v29 = vpop.f32.mrf.mxu0 }
 0x1b3   : > { %v7558_v55 = vpop.f32.mrf.mxu1 }
 0x1b4   : > { %v7560_v18 = vpop.f32.mrf.mxu0 }
 0x1b5   : > { %v7562_v40 = vpop.f32.mrf.mxu1 }
 0x1b6   : > { %v7564_v61 = vpop.f32.mrf.mxu0 }
 0x1b7   : > { %v7566_v44 = vpop.f32.mrf.mxu1 }
 0x1b8   : > { %v7568_v47 = vpop.f32.mrf.mxu0 }
 0x1b9   : > { %8047 = vst [vmem:[#allocation35_spill] sm:$0xff] %v7568_v47  ;;  %v7570_v4 = vpop.f32.mrf.mxu1 }
 0x1ba   : > { %v7572_v8 = vpop.f32.mrf.mxu0 }
 0x1bb   : > { %8048 = vst [vmem:[#allocation36_spill] sm:$0xff] %v7572_v8  ;;  %v7574_v34 = vpop.f32.mrf.mxu1 }
 0x1bc   : > { %v7576_v31 = vpop.f32.mrf.mxu0 }
 0x1bd   : > { %8049 = vst [vmem:[#allocation37_spill] sm:$0xff] %v7576_v31  ;;  %v7578_v26 = vpop.f32.mrf.mxu1 }
 0x1be   : > { %v7580_v43 = vpop.f32.mrf.mxu0 }
 0x1bf   : > { %8050 = vst [vmem:[#allocation38_spill] sm:$0xff] %v7580_v43  ;;  %v7582_v24 = vpop.f32.mrf.mxu1 }
 0x1c0   : > { %8051 = vst [vmem:[#allocation39_spill] sm:$0xff] %v7582_v24  ;;  %v7584_v62 = vpop.f32.mrf.mxu0 }
 0x1c1   : > { %8052 = vst [vmem:[#allocation11_spill] sm:$0xff] %v7584_v62  ;;  %v7586_v50 = vpop.f32.mrf.mxu1 }
 0x1c2   : > { %8053 = vst [vmem:[#allocation12_spill] sm:$0xff] %v7586_v50  ;;  %v7588_v48 = vpop.f32.mrf.mxu0 }
 0x1c3   : > { %8054 = vst [vmem:[#allocation15_spill] sm:$0xff] %v7588_v48  ;;  %v7590_v9 = vpop.f32.mrf.mxu1 }
 0x1c4   : > { %8055 = vst [vmem:[#allocation13_spill] sm:$0xff] %v7590_v9  ;;  %v7592_v33 = vpop.f32.mrf.mxu0 }
 0x1c5   : > { %8056 = vst [vmem:[#allocation17_spill] sm:$0xff] %v7592_v33  ;;  %v7594_v49 = vpop.f32.mrf.mxu1 }
 0x1c6   : > { %8057 = vst [vmem:[#allocation14_spill] sm:$0xff] %v7594_v49  ;;  %v7596_v8 = vpop.f32.mrf.mxu0 }
 0x1c7   : > { %8058 = vst [vmem:[#allocation40_spill] sm:$0xff] %v7596_v8  ;;  %v7598_v31 = vpop.f32.mrf.mxu1 }
 0x1c8   : > { %8059 = vst [vmem:[#allocation16_spill] sm:$0xff] %v7598_v31  ;;  %v7600_v2 = vpop.f32.mrf.mxu0 }
 0x1c9   : > { %8060 = vst [vmem:[#allocation41_spill] sm:$0xff] %v7600_v2  ;;  %v7602_v43 = vpop.f32.mrf.mxu1 }
 0x1ca   : > { %8061 = vst [vmem:[#allocation18_spill] sm:$0xff] %v7602_v43  ;;  %v7604_v62 = vpop.f32.mrf.mxu0 }
 0x1cb   : > { %8062 = vst [vmem:[#allocation19_spill] sm:$0xff] %v7604_v62  ;;  %v7606_v50 = vpop.f32.mrf.mxu1 }
 0x1cc   : > { %8063 = vst [vmem:[#allocation20_spill] sm:$0xff] %v7606_v50  ;;  %v7608_v48 = vpop.f32.mrf.mxu0 }
 0x1cd   : > { %8064 = vst [vmem:[#allocation42_spill] sm:$0xff] %v7608_v48  ;;  %v7610_v9 = vpop.f32.mrf.mxu1  ;;  %v3109_v48 = vadd.f32 %v5788_v22, %v7415_v36  ;;  %v3110_v22 = vadd.f32 %v7522_v27, %v7424_v14  ;;  %v3114_v27 = vadd.f32 %v7538_v19, %v7436_v10 }
 0x1ce   : > { %8065 = vst [vmem:[#allocation43_spill] sm:$0xff] %v7610_v9  ;;  %v7612_v33 = vpop.f32.mrf.mxu0 }
 0x1cf   : > { %8066 = vst [vmem:[#allocation44_spill] sm:$0xff] %v7612_v33  ;;  %v7614_v49 = vpop.f32.mrf.mxu1  ;;  %v3108_v33 = vadd.f32 %v2949_v56, %v7418_v39  ;;  %v3113_v39 = vadd.f32 %v7526_v5, %v7427_v32 }
 0x1d0   : > { %8067 = vst [vmem:[#allocation45_spill] sm:$0xff] %v7614_v49  ;;  %v7616_v8 = vpop.f32.mrf.mxu0 }
 0x1d1   : > { %8068 = vst [vmem:[#allocation46_spill] sm:$0xff] %v7616_v8  ;;  %v7618_v31 = vpop.f32.mrf.mxu1  ;;  %v3563_v36 = vadd.f32 %v7507_v6, %v3108_v33  ;;  %v3112_v33 = vadd.f32 %v7530_v54, %v7430_v3  ;;  %v3115_v3 = vadd.f32 %v7534_v41, %v7433_v30 }
 0x1d2   : > { %8069 = vst [vmem:[#allocation47_spill] sm:$0xff] %v7618_v31  ;;  %v7620_v2 = vpop.f32.mrf.mxu0 }
 0x1d3   : > { %8070 = vst [vmem:[#allocation48_spill] sm:$0xff] %v7620_v2  ;;  %v7622_v43 = vpop.f32.mrf.mxu1  ;;  %v3567_v5 = vadd.f32 %v7524_v45, %v3112_v33  ;;  %v3570_v10 = vadd.f32 %v7528_v11, %v3115_v3  ;;  %v3569_v45 = vadd.f32 %v7532_v16, %v3114_v27  ;;  %v3121_v27 = vadd.f32 %v7558_v55, %v7451_v12 }
 0x1d4   : > { %8071 = vst [vmem:[#allocation49_spill] sm:$0xff] %v7622_v43  ;;  %v7624_v24 = vpop.f32.mrf.mxu0  ;;  %v3564_v43 = vadd.f32 %v7502_v46, %v3109_v48 }
 0x1d5   : > { %8072 = vst [vmem:[#allocation50_spill] sm:$0xff] %v7624_v24  ;;  %v7626_v62 = vpop.f32.mrf.mxu1  ;;  %v3111_v24 = vadd.f32 %v7518_v28, %v7421_v15  ;;  %v3565_v28 = vadd.f32 %v7516_v1, %v3110_v22 }
 0x1d6   : > { %8073 = vst [vmem:[#allocation51_spill] sm:$0xff] %v7626_v62  ;;  %v7628_v50 = vpop.f32.mrf.mxu0 }
 0x1d7   : > { %8074 = vst [vmem:[#allocation52_spill] sm:$0xff] %v7628_v50  ;;  %v7631_v9 = vpop.f32.mrf.mxu1  ;;  %v3566_v49 = vadd.f32 %v7512_v25, %v3111_v24 }
 0x1d8   : > { %8075 = vst [vmem:[#allocation53_spill] sm:$0xff] %v7631_v9  ;;  %v5938_v8 = vpop.f32.mrf.mxu0 }
 0x1d9   : > { %v7637_v31 = vpop.f32.mrf.mxu1 }
 0x1da   : > { %8076 = vst [vmem:[#allocation54_spill] sm:$0xff] %v7637_v31  ;;  %v4312_v2 = vpop.f32.mrf.mxu0 }
 0x1db   : > { %v5888_v50 = vpop.f32.mrf.mxu1 }
 0x1dc   : > { %v5941_v62 = vpop.f32.mrf.mxu0  ;;  %v4018_v9 = vadd.f32 %v5888_v50, %v3564_v43  ;;  %v3568_v50 = vadd.f32 %v7520_v20, %v3113_v39 }
 0x1dd   : > { %v3858_v56 = vpop.f32.mrf.mxu1 }
 0x1de   : > { %v4322_v31 = vpop.f32.mrf.mxu0  ;;  %v4472_v48 = vadd.f32 %v5938_v8, %v4018_v9  ;;  %v4017_v46 = vadd.f32 %v3858_v56, %v3563_v36  ;;  %v3117_v36 = vadd.f32 %v7542_v53, %v7439_v51  ;;  %v3116_v53 = vadd.f32 %v7546_v42, %v7442_v37 }
 0x1df   : > { %v5891_v47 = vpop.f32.mrf.mxu1 }
 0x1e0   : > { %v5944_v15 = vpop.f32.mrf.mxu0  ;;  %4568 = vst [vmem:[%s7652_s8 + $0x8] sm:$0xff] %v4472_v48  ;;  %v4471_v14 = vadd.f32 %v4312_v2, %v4017_v46  ;;  %v4020_v32 = vadd.f32 %v5891_v47, %v3566_v49  ;;  %v4638_v24 = vmul.f32 %v4472_v48, %v4472_v48  ;;  %v3572_v51 = vadd.f32 %v7536_v13, %v3117_v36 }
 0x1e1   : > { %v3868_v9 = vpop.f32.mrf.mxu1 }
 0x1e2   : > { %v4332_v43 = vpop.f32.mrf.mxu0  ;;  %4567 = vst [vmem:[%s7652_s8] sm:$0xff] %v4471_v14  ;;  %v4599_v6 = vadd.f32 %v4472_v48, %v4471_v14  ;;  %v4637_v8 = vmul.f32 %v4471_v14, %v4471_v14  ;;  %v4474_v25 = vadd.f32 %v5941_v62, %v4020_v32  ;;  %v4019_v1 = vadd.f32 %v3868_v9, %v3565_v28 }
 0x1e3   : > { %v5894_v2 = vpop.f32.mrf.mxu1 }
 0x1e4   : > { %v5947_v49 = vpop.f32.mrf.mxu0  ;;  %v4669_v20 = vadd.f32 %v4638_v24, %v4637_v8  ;;  %4570 = vst [vmem:[%s7652_s8 + $0x18] sm:$0xff] %v4474_v25  ;;  %v4473_v54 = vadd.f32 %v4322_v31, %v4019_v1  ;;  %v4022_v47 = vadd.f32 %v5894_v2, %v3568_v50  ;;  %v4640_v31 = vmul.f32 %v4474_v25, %v4474_v25 }
 0x1e5   : > { %v3878_v62 = vpop.f32.mrf.mxu1  ;;  %v3571_v1 = vadd.f32 %v7540_v63, %v3116_v53 }
 0x1e6   : > { %v4342_v22 = vpop.f32.mrf.mxu0  ;;  %4569 = vst [vmem:[%s7652_s8 + $0x10] sm:$0xff] %v4473_v54  ;;  %v4600_v39 = vadd.f32 %v4599_v6, %v4473_v54  ;;  %v4639_v30 = vmul.f32 %v4473_v54, %v4473_v54  ;;  %v4476_v41 = vadd.f32 %v5944_v15, %v4022_v47  ;;  %v4021_v56 = vadd.f32 %v3878_v62, %v3567_v5 }
 0x1e7   : > { %v5897_v19 = vpop.f32.mrf.mxu1  ;;  %v3119_v15 = vadd.f32 %v7550_v59, %v7445_v35  ;;  %v3120_v47 = vadd.f32 %v7562_v40, %v7454_v38 }
 0x1e8   : > { %v5950_v48 = vpop.f32.mrf.mxu0  ;;  %v4670_v46 = vadd.f32 %v4669_v20, %v4639_v30  ;;  %4572 = vst [vmem:[%s7652_s8 + $0x28] sm:$0xff] %v4476_v41  ;;  %v4475_v28 = vadd.f32 %v4332_v43, %v4021_v56  ;;  %v4601_v33 = vadd.f32 %v4600_v39, %v4474_v25  ;;  %v4024_v14 = vadd.f32 %v5897_v19, %v3570_v10 }
 0x1e9   : > { %v3888_v32 = vpop.f32.mrf.mxu1  ;;  %v3118_v43 = vadd.f32 %v7554_v57, %v7448_v58  ;;  %v4642_v13 = vmul.f32 %v4476_v41, %v4476_v41  ;;  %v3574_v3 = vadd.f32 %v7544_v7, %v3119_v15  ;;  %v3576_v39 = vadd.f32 %v7552_v52, %v3121_v27 }
 0x1ea   : > { %v4352_v11 = vpop.f32.mrf.mxu0  ;;  %4571 = vst [vmem:[%s7652_s8 + $0x20] sm:$0xff] %v4475_v28  ;;  %v4602_v16 = vadd.f32 %v4601_v33, %v4475_v28  ;;  %v4641_v50 = vmul.f32 %v4475_v28, %v4475_v28  ;;  %v4671_v24 = vadd.f32 %v4670_v46, %v4640_v31  ;;  %v4023_v9 = vadd.f32 %v3888_v32, %v3569_v45 }
 0x1eb   : > { %v4478_v6 = vadd.f32 %v5947_v49, %v4024_v14  ;;  %v5900_v8 = vpop.f32.mrf.mxu1  ;;  %v3573_v54 = vadd.f32 %v7548_v60, %v3118_v43  ;;  %v3123_v60 = vadd.f32 %v7566_v44, %v7457_v21  ;;  %v3575_v46 = vadd.f32 %v7556_v29, %v3120_v47 }
 0x1ec   : > { %v5953_v37 = vpop.f32.mrf.mxu0  ;;  %v4672_v42 = vadd.f32 %v4671_v24, %v4641_v50  ;;  %v4477_v25 = vadd.f32 %v4342_v22, %v4023_v9  ;;  %v4603_v35 = vadd.f32 %v4602_v16, %v4476_v41  ;;  %v4026_v59 = vadd.f32 %v5900_v8, %v3572_v51 }
 0x1ed   : > { %4574 = vst [vmem:[%s7652_s8 + $0x38] sm:$0xff] %v4478_v6  ;;  %v3898_v2 = vpop.f32.mrf.mxu1  ;;  %v4644_v62 = vmul.f32 %v4478_v6, %v4478_v6  ;;  %v3122_v52 = vadd.f32 %v7570_v4, %v7460_v0  ;;  %v3125_v21 = vadd.f32 %v7574_v34, %v7463_v17  ;;  %v3578_v32 = vadd.f32 %v7560_v18, %v3123_v60 }
 0x1ee   : > { %v4362_v5 = vpop.f32.mrf.mxu0  ;;  %4573 = vst [vmem:[%s7652_s8 + $0x30] sm:$0xff] %v4477_v25  ;;  %v4604_v58 = vadd.f32 %v4603_v35, %v4477_v25  ;;  %v4643_v57 = vmul.f32 %v4477_v25, %v4477_v25  ;;  %v4673_v49 = vadd.f32 %v4672_v42, %v4642_v13  ;;  %v4480_v20 = vadd.f32 %v5950_v48, %v4026_v59  ;;  %v8077_v13 = vld [vmem:[#allocation35_spill] sm:$0xff]  ;;  %v8078_v35 = vld [vmem:[#allocation21_spill] sm:$0xff] }
 0x1ef   : > { %v4025_v63 = vadd.f32 %v3898_v2, %v3571_v1  ;;  %v5903_v7 = vpop.f32.mrf.mxu1  ;;  %v3577_v9 = vadd.f32 %v7564_v61, %v3122_v52  ;;  %v3124_v17 = vadd.f32 %v7578_v26, %v7466_v23  ;;  %v8079_v59 = vld [vmem:[#allocation39_spill] sm:$0xff]  ;;  %v8087_v52 = vld [vmem:[#allocation24_spill] sm:$0xff] }
 0x1f0   : > { %v5956_v36 = vpop.f32.mrf.mxu0  ;;  %v4674_v12 = vadd.f32 %v4673_v49, %v4643_v57  ;;  %4576 = vst [vmem:[%s7652_s8 + $0x48] sm:$0xff] %v4480_v20  ;;  %v4605_v55 = vadd.f32 %v4604_v58, %v4478_v6  ;;  %v4028_v22 = vadd.f32 %v5903_v7, %v3574_v3  ;;  %v4646_v44 = vmul.f32 %v4480_v20, %v4480_v20  ;;  %v8080_v58 = vld [vmem:[#allocation36_spill] sm:$0xff]  ;;  %v8081_v49 = vld [vmem:[#allocation22_spill] sm:$0xff]  ;;  %v8083_v7 = vld [vmem:[#allocation23_spill] sm:$0xff] }
 0x1f1   : > { %v4479_v30 = vadd.f32 %v4352_v11, %v4025_v63  ;;  %v3908_v41 = vpop.f32.mrf.mxu1  ;;  %v3580_v6 = vadd.f32 %v8077_v13, %v3125_v21  ;;  %v3127_v1 = vadd.f32 %v8079_v59, %v8078_v35  ;;  %v3579_v57 = vadd.f32 %v8080_v58, %v3124_v17  ;;  %v8095_v59 = vld [vmem:[#allocation27_spill] sm:$0xff] }
 0x1f2   : > { %v4372_v56 = vpop.f32.mrf.mxu0  ;;  %v4675_v10 = vadd.f32 %v4674_v12, %v4644_v62  ;;  %v4482_v38 = vadd.f32 %v5953_v37, %v4028_v22  ;;  %v4027_v40 = vadd.f32 %v3908_v41, %v3573_v54  ;;  %v8085_v41 = vld [vmem:[#allocation37_spill] sm:$0xff] }
 0x1f3   : > { %4575 = vst [vmem:[%s7652_s8 + $0x40] sm:$0xff] %v4479_v30  ;;  %v4606_v45 = vadd.f32 %v4605_v55, %v4479_v30  ;;  %v4645_v19 = vmul.f32 %v4479_v30, %v4479_v30  ;;  %v5906_v48 = vpop.f32.mrf.mxu1 }
 0x1f4   : > { %v5959_v31 = vpop.f32.mrf.mxu0  ;;  %4578 = vst [vmem:[%s7652_s8 + $0x58] sm:$0xff] %v4482_v38  ;;  %v4481_v28 = vadd.f32 %v4362_v5, %v4027_v40  ;;  %v4030_v33 = vadd.f32 %v5906_v48, %v3576_v39  ;;  %v4648_v18 = vmul.f32 %v4482_v38, %v4482_v38 }
 0x1f5   : > { %v4676_v51 = vadd.f32 %v4675_v10, %v4645_v19  ;;  %v4607_v53 = vadd.f32 %v4606_v45, %v4480_v20  ;;  %v3918_v15 = vpop.f32.mrf.mxu1  ;;  %v8082_v20 = vld [vmem:[#allocation12_spill] sm:$0xff] }
 0x1f6   : > { %v4382_v14 = vpop.f32.mrf.mxu0  ;;  %4577 = vst [vmem:[%s7652_s8 + $0x50] sm:$0xff] %v4481_v28  ;;  %v4647_v11 = vmul.f32 %v4481_v28, %v4481_v28  ;;  %v4484_v29 = vadd.f32 %v5956_v36, %v4030_v33  ;;  %v4029_v16 = vadd.f32 %v3918_v15, %v3575_v46  ;;  %v3126_v54 = vadd.f32 %v8082_v20, %v8081_v49  ;;  %v8084_v36 = vld [vmem:[#allocation13_spill] sm:$0xff] }
 0x1f7   : > { %v4608_v50 = vadd.f32 %v4607_v53, %v4481_v28  ;;  %v4677_v0 = vadd.f32 %v4676_v51, %v4646_v44  ;;  %v5909_v4 = vpop.f32.mrf.mxu1  ;;  %v3129_v62 = vadd.f32 %v8084_v36, %v8083_v7  ;;  %v8088_v28 = vld [vmem:[#allocation14_spill] sm:$0xff]  ;;  %v8089_v51 = vld [vmem:[#allocation11_spill] sm:$0xff]  ;;  %v8098_v36 = vld [vmem:[#allocation40_spill] sm:$0xff] }
 0x1f8   : > { %v5962_v24 = vpop.f32.mrf.mxu0  ;;  %4580 = vst [vmem:[%s7652_s8 + $0x68] sm:$0xff] %v4484_v29  ;;  %v4483_v34 = vadd.f32 %v4372_v56, %v4029_v16  ;;  %v4032_v43 = vadd.f32 %v5909_v4, %v3578_v32  ;;  %v4650_v12 = vmul.f32 %v4484_v29, %v4484_v29  ;;  %v3582_v56 = vadd.f32 %v8085_v41, %v3127_v1  ;;  %v8090_v16 = vld [vmem:[#allocation25_spill] sm:$0xff]  ;;  %v8096_v1 = vld [vmem:[#allocation20_spill] sm:$0xff] }
 0x1f9   : > { %v4678_v8 = vadd.f32 %v4677_v0, %v4647_v11  ;;  %v4609_v37 = vadd.f32 %v4608_v50, %v4482_v38  ;;  %v3928_v42 = vpop.f32.mrf.mxu1  ;;  %v3128_v33 = vadd.f32 %v8088_v28, %v8087_v52  ;;  %v3584_v53 = vadd.f32 %v8089_v51, %v3129_v62  ;;  %v8091_v50 = vld [vmem:[#allocation16_spill] sm:$0xff]  ;;  %v8101_v41 = vld [vmem:[#allocation41_spill] sm:$0xff] }
 0x1fa   : > { %v4392_v25 = vpop.f32.mrf.mxu0  ;;  %4579 = vst [vmem:[%s7652_s8 + $0x60] sm:$0xff] %v4483_v34  ;;  %v4649_v3 = vmul.f32 %v4483_v34, %v4483_v34  ;;  %v4486_v61 = vadd.f32 %v5959_v31, %v4032_v43  ;;  %v4031_v27 = vadd.f32 %v3928_v42, %v3577_v9  ;;  %v8086_v31 = vld [vmem:[#allocation38_spill] sm:$0xff]  ;;  %v3131_v0 = vadd.f32 %v8091_v50, %v8090_v16  ;;  %v8107_v50 = vld [vmem:[#allocation31_spill] sm:$0xff] }
 0x1fb   : > { %v4610_v2 = vadd.f32 %v4609_v37, %v4483_v34  ;;  %v4679_v23 = vadd.f32 %v4678_v8, %v4648_v18  ;;  %v5912_v26 = vpop.f32.mrf.mxu1  ;;  %v3581_v46 = vadd.f32 %v8086_v31, %v3126_v54  ;;  %v8093_v8 = vld [vmem:[#allocation26_spill] sm:$0xff] }
 0x1fc   : > { %v5965_v5 = vpop.f32.mrf.mxu0  ;;  %4582 = vst [vmem:[%s7652_s8 + $0x78] sm:$0xff] %v4486_v61  ;;  %v4485_v47 = vadd.f32 %v4382_v14, %v4031_v27  ;;  %v4034_v63 = vadd.f32 %v5912_v26, %v3580_v6  ;;  %v4652_v15 = vmul.f32 %v4486_v61, %v4486_v61  ;;  %v8092_v6 = vld [vmem:[#allocation15_spill] sm:$0xff]  ;;  %v8094_v37 = vld [vmem:[#allocation18_spill] sm:$0xff] }
 0x1fd   : > { %v4680_v55 = vadd.f32 %v4679_v23, %v4649_v3  ;;  %v4611_v22 = vadd.f32 %v4610_v2, %v4484_v29  ;;  %v3938_v39 = vpop.f32.mrf.mxu1  ;;  %v3583_v18 = vadd.f32 %v8092_v6, %v3128_v33  ;;  %v3130_v42 = vadd.f32 %v8094_v37, %v8093_v8 }
 0x1fe   : > { %v4402_v30 = vpop.f32.mrf.mxu0  ;;  %4581 = vst [vmem:[%s7652_s8 + $0x70] sm:$0xff] %v4485_v47  ;;  %v4651_v60 = vmul.f32 %v4485_v47, %v4485_v47  ;;  %v4488_v10 = vadd.f32 %v5962_v24, %v4034_v63  ;;  %v4033_v38 = vadd.f32 %v3938_v39, %v3579_v57  ;;  %v3133_v3 = vadd.f32 %v8096_v1, %v8095_v59  ;;  %v8110_v1 = vld [vmem:[#allocation44_spill] sm:$0xff] }
 0x1ff   : > { %v4612_v40 = vadd.f32 %v4611_v22, %v4485_v47  ;;  %v4681_v45 = vadd.f32 %v4680_v55, %v4650_v12  ;;  %v5915_v19 = vpop.f32.mrf.mxu1  ;;  %v3585_v62 = vadd.f32 %v8098_v36, %v3130_v42  ;;  %v8099_v12 = vld [vmem:[#allocation28_spill] sm:$0xff]  ;;  %v8100_v55 = vld [vmem:[#allocation43_spill] sm:$0xff] }
 0x200   : > { %v5968_v48 = vpop.f32.mrf.mxu0  ;;  %4584 = vst [vmem:[%s7652_s8 + $0x88] sm:$0xff] %v4488_v10  ;;  %v4487_v21 = vadd.f32 %v4392_v25, %v4033_v38  ;;  %v4036_v44 = vadd.f32 %v5915_v19, %v3582_v56  ;;  %v3132_v22 = vadd.f32 %v8100_v55, %v8099_v12  ;;  %v3588_v56 = vadd.f32 %v8101_v41, %v3133_v3  ;;  %v8102_v19 = vld [vmem:[#allocation29_spill] sm:$0xff]  ;;  %v8116_v41 = vld [vmem:[#allocation48_spill] sm:$0xff] }
 0x201   : > { %v4682_v14 = vadd.f32 %v4681_v45, %v4651_v60  ;;  %v4613_v32 = vadd.f32 %v4612_v40, %v4486_v61  ;;  %v3948_v11 = vpop.f32.mrf.mxu1  ;;  %v4654_v61 = vmul.f32 %v4488_v10, %v4488_v10 }
 0x202   : > { %v4412_v29 = vpop.f32.mrf.mxu0  ;;  %4583 = vst [vmem:[%s7652_s8 + $0x80] sm:$0xff] %v4487_v21  ;;  %v4653_v4 = vmul.f32 %v4487_v21, %v4487_v21  ;;  %v4490_v24 = vadd.f32 %v5965_v5, %v4036_v44  ;;  %v4035_v9 = vadd.f32 %v3948_v11, %v3581_v46  ;;  %v8097_v5 = vld [vmem:[#allocation17_spill] sm:$0xff] }
 0x203   : > { %v4614_v17 = vadd.f32 %v4613_v32, %v4487_v21  ;;  %v4683_v34 = vadd.f32 %v4682_v14, %v4652_v15  ;;  %v5918_v43 = vpop.f32.mrf.mxu1  ;;  %v3586_v58 = vadd.f32 %v8097_v5, %v3131_v0  ;;  %v8105_v14 = vld [vmem:[#allocation30_spill] sm:$0xff]  ;;  %v8106_v32 = vld [vmem:[#allocation47_spill] sm:$0xff]  ;;  %v8108_v0 = vld [vmem:[#allocation49_spill] sm:$0xff] }
 0x204   : > { %v5971_v13 = vpop.f32.mrf.mxu0  ;;  %4586 = vst [vmem:[%s7652_s8 + $0x98] sm:$0xff] %v4490_v24  ;;  %v4489_v25 = vadd.f32 %v4402_v30, %v4035_v9  ;;  %v4038_v35 = vadd.f32 %v5918_v43, %v3584_v53  ;;  %v4656_v60 = vmul.f32 %v4490_v24, %v4490_v24  ;;  %v8104_v53 = vld [vmem:[#allocation19_spill] sm:$0xff]  ;;  %v3134_v11 = vadd.f32 %v8106_v32, %v8105_v14  ;;  %v8113_v5 = vld [vmem:[#allocation46_spill] sm:$0xff]  ;;  %v8120_v32 = vld [vmem:[#allocation52_spill] sm:$0xff] }
 0x205   : > { %v4684_v27 = vadd.f32 %v4683_v34, %v4653_v4  ;;  %v4615_v2 = vadd.f32 %v4614_v17, %v4488_v10  ;;  %v3958_v23 = vpop.f32.mrf.mxu1  ;;  %v3587_v15 = vadd.f32 %v8104_v53, %v3132_v22  ;;  %v3137_v4 = vadd.f32 %v8108_v0, %v8107_v50 }
 0x206   : > { %v4422_v26 = vpop.f32.mrf.mxu0  ;;  %4585 = vst [vmem:[%s7652_s8 + $0x90] sm:$0xff] %v4489_v25  ;;  %v4655_v57 = vmul.f32 %v4489_v25, %v4489_v25  ;;  %v4492_v49 = vadd.f32 %v5968_v48, %v4038_v35  ;;  %v4037_v20 = vadd.f32 %v3958_v23, %v3583_v18  ;;  %v8103_v48 = vld [vmem:[#allocation45_spill] sm:$0xff]  ;;  %v3589_v3 = vadd.f32 %v8110_v1, %v3134_v11 }
 0x207   : > { %v4616_v54 = vadd.f32 %v4615_v2, %v4489_v25  ;;  %v4685_v47 = vadd.f32 %v4684_v27, %v4654_v61  ;;  %v5921_v63 = vpop.f32.mrf.mxu1  ;;  %v3135_v31 = vadd.f32 %v8103_v48, %v8102_v19  ;;  %v8111_v61 = vld [vmem:[#allocation32_spill] sm:$0xff]  ;;  %v8112_v27 = vld [vmem:[#allocation51_spill] sm:$0xff] }
 0x208   : > { %v5974_v7 = vpop.f32.mrf.mxu0  ;;  %4588 = vst [vmem:[%s7652_s8 + $0xa8] sm:$0xff] %v4492_v49  ;;  %v4491_v39 = vadd.f32 %v4412_v29, %v4037_v20  ;;  %v4040_v30 = vadd.f32 %v5921_v63, %v3586_v58  ;;  %v3136_v2 = vadd.f32 %v8112_v27, %v8111_v61  ;;  %v3592_v58 = vadd.f32 %v8113_v5, %v3137_v4  ;;  %v8115_v63 = vld [vmem:[#allocation53_spill] sm:$0xff] }
 0x209   : > { %v4686_v10 = vadd.f32 %v4685_v47, %v4655_v57  ;;  %v4617_v38 = vadd.f32 %v4616_v54, %v4490_v24  ;;  %v3968_v40 = vpop.f32.mrf.mxu1  ;;  %v4658_v24 = vmul.f32 %v4492_v49, %v4492_v49  ;;  %v8114_v47 = vld [vmem:[#allocation33_spill] sm:$0xff] }
 0x20a   : > { %v4432_v45 = vpop.f32.mrf.mxu0  ;;  %4587 = vst [vmem:[%s7652_s8 + $0xa0] sm:$0xff] %v4491_v39  ;;  %v4657_v46 = vmul.f32 %v4491_v39, %v4491_v39  ;;  %v4494_v52 = vadd.f32 %v5971_v13, %v4040_v30  ;;  %v4039_v28 = vadd.f32 %v3968_v40, %v3585_v62  ;;  %v8109_v13 = vld [vmem:[#allocation42_spill] sm:$0xff] }
 0x20b   : > { %v4618_v33 = vadd.f32 %v4617_v38, %v4491_v39  ;;  %v4687_v21 = vadd.f32 %v4686_v10, %v4656_v60  ;;  %v5924_v44 = vpop.f32.mrf.mxu1  ;;  %v3590_v6 = vadd.f32 %v8109_v13, %v3135_v31  ;;  %v8117_v60 = vld [vmem:[#allocation34_spill] sm:$0xff] }
 0x20c   : > { %v5977_v51 = vpop.f32.mrf.mxu0  ;;  %4590 = vst [vmem:[%s7652_s8 + $0xb8] sm:$0xff] %v4494_v52  ;;  %v4493_v29 = vadd.f32 %v4422_v26, %v4039_v28  ;;  %v4042_v16 = vadd.f32 %v5924_v44, %v3588_v56  ;;  %v4660_v57 = vmul.f32 %v4494_v52, %v4494_v52  ;;  %v3591_v56 = vadd.f32 %v8116_v41, %v3136_v2  ;;  %v8118_v10 = vld [vmem:[#allocation54_spill] sm:$0xff] }
 0x20d   : > { %v4688_v9 = vadd.f32 %v4687_v21, %v4657_v46  ;;  %v4619_v17 = vadd.f32 %v4618_v33, %v4492_v49  ;;  %v3978_v34 = vpop.f32.mrf.mxu1  ;;  %v3138_v38 = vadd.f32 %v8118_v10, %v8117_v60 }
 0x20e   : > { %v4442_v43 = vpop.f32.mrf.mxu0  ;;  %4589 = vst [vmem:[%s7652_s8 + $0xb0] sm:$0xff] %v4493_v29  ;;  %v4659_v18 = vmul.f32 %v4493_v29, %v4493_v29  ;;  %v4496_v8 = vadd.f32 %v5974_v7, %v4042_v16  ;;  %v4041_v37 = vadd.f32 %v3978_v34, %v3587_v15  ;;  %v3139_v7 = vadd.f32 %v8115_v63, %v8114_v47 }
 0x20f   : > { %v4620_v42 = vadd.f32 %v4619_v17, %v4493_v29  ;;  %v4689_v25 = vadd.f32 %v4688_v9, %v4658_v24  ;;  %v5927_v35 = vpop.f32.mrf.mxu1  ;;  %v3593_v11 = vadd.f32 %v8120_v32, %v3138_v38 }
 0x210   : > { %v5980_v59 = vpop.f32.mrf.mxu0  ;;  %4592 = vst [vmem:[%s7652_s8 + $0xc8] sm:$0xff] %v4496_v8  ;;  %v4495_v23 = vadd.f32 %v4432_v45, %v4041_v37  ;;  %v4044_v26 = vadd.f32 %v5927_v35, %v3590_v6  ;;  %v4662_v19 = vmul.f32 %v4496_v8, %v4496_v8 }
 0x211   : > { %v4690_v49 = vadd.f32 %v4689_v25, %v4659_v18  ;;  %v4621_v20 = vadd.f32 %v4620_v42, %v4494_v52  ;;  %v3988_v54 = vpop.f32.mrf.mxu1  ;;  %v8119_v52 = vld [vmem:[#allocation50_spill] sm:$0xff] }
 0x212   : > { %4591 = vst [vmem:[%s7652_s8 + $0xc0] sm:$0xff] %v4495_v23  ;;  %v4661_v36 = vmul.f32 %v4495_v23, %v4495_v23  ;;  %v4498_v62 = vadd.f32 %v5977_v51, %v4044_v26  ;;  %v4043_v12 = vadd.f32 %v3988_v54, %v3589_v3  ;;  %v4452_v30 = vpop.f32.mrf.mxu0  ;;  %v3594_v28 = vadd.f32 %v8119_v52, %v3139_v7 }
 0x213   : > { %v4622_v55 = vadd.f32 %v4621_v20, %v4495_v23  ;;  %v4691_v22 = vadd.f32 %v4690_v49, %v4660_v57  ;;  %v5930_v39 = vpop.f32.mrf.mxu1 }
 0x214   : > { %4594 = vst [vmem:[%s7652_s8 + $0xd8] sm:$0xff] %v4498_v62  ;;  %v4497_v40 = vadd.f32 %v4442_v43, %v4043_v12  ;;  %v4046_v45 = vadd.f32 %v5930_v39, %v3592_v58  ;;  %v5983_v14 = vpop.f32.mrf.mxu0  ;;  %v4664_v50 = vmul.f32 %v4498_v62, %v4498_v62 }
 0x215   : > { %v4692_v48 = vadd.f32 %v4691_v22, %v4661_v36  ;;  %v4623_v31 = vadd.f32 %v4622_v55, %v4496_v8  ;;  %v3998_v46 = vpop.f32.mrf.mxu1 }
 0x216   : > { %4593 = vst [vmem:[%s7652_s8 + $0xd0] sm:$0xff] %v4497_v40  ;;  %v4663_v33 = vmul.f32 %v4497_v40, %v4497_v40  ;;  %v4500_v21 = vadd.f32 %v5980_v59, %v4046_v45  ;;  %v4045_v44 = vadd.f32 %v3998_v46, %v3591_v56  ;;  %v4462_v6 = vpop.f32.mrf.mxu0 }
 0x217   : > { %v4624_v51 = vadd.f32 %v4623_v31, %v4497_v40  ;;  %v4693_v53 = vadd.f32 %v4692_v48, %v4662_v19  ;;  %v5933_v15 = vpop.f32.mrf.mxu1 }
 0x218   : > { %4596 = vst [vmem:[%s7652_s8 + $0xe8] sm:$0xff] %v4500_v21  ;;  %v4499_v29 = vadd.f32 %v4452_v30, %v4045_v44  ;;  %v4048_v16 = vadd.f32 %v5933_v15, %v3594_v28  ;;  %v4666_v8 = vmul.f32 %v4500_v21, %v4500_v21 }
 0x219   : > { %v4694_v0 = vadd.f32 %v4693_v53, %v4663_v33  ;;  %v4625_v4 = vadd.f32 %v4624_v51, %v4498_v62  ;;  %v4008_v24 = vpop.f32.mrf.mxu1 }
 0x21a   : > { %4595 = vst [vmem:[%s7652_s8 + $0xe0] sm:$0xff] %v4499_v29  ;;  %v4665_v9 = vmul.f32 %v4499_v29, %v4499_v29  ;;  %v4502_v17 = vadd.f32 %v5983_v14, %v4048_v16  ;;  %v4047_v34 = vadd.f32 %v4008_v24, %v3593_v11 }
 0x21b   : > { %v4626_v43 = vadd.f32 %v4625_v4, %v4499_v29  ;;  %v4695_v13 = vadd.f32 %v4694_v0, %v4664_v50 }
 0x21c   : > { %4598 = vst [vmem:[%s7652_s8 + $0xf8] sm:$0xff] %v4502_v17  ;;  %v4501_v18 = vadd.f32 %v4462_v6, %v4047_v34 }
 0x21d   : > { %v4696_v37 = vadd.f32 %v4695_v13, %v4665_v9  ;;  %v4627_v42 = vadd.f32 %v4626_v43, %v4500_v21 }
 0x21e   : > { %4597 = vst [vmem:[%s7652_s8 + $0xf0] sm:$0xff] %v4501_v18  ;;  %v4667_v25 = vmul.f32 %v4501_v18, %v4501_v18 }
 0x21f   : > { %v4628_v35 = vadd.f32 %v4627_v42, %v4501_v18  ;;  %v4697_v59 = vadd.f32 %v4696_v37, %v4666_v8 }
 0x220   : > { %6067 = shalt.err (!%p6064_p5)
}
 0x221   : > { %s6068_s7 = scalar_lea.hbm %s7769_s13, 4096  ;;  %s6072_s11 = scalar_lea.hbm %s7895_s3, 8192 }
 0x222   : > { %p6069_p6 = scmp.ne.s32.totalorder %s7769_s13, %s6068_s7  ;;  %p6073_p10 = scmp.lt.s32.totalorder %s7769_s13, %s7895_s3 }
 0x223   : > { %p6074_p11 = scmp.lt.s32.totalorder %s6072_s11, %s6068_s7 }
 0x224   : > { %p6070_p7 = pnand %p6069_p6, %p6266_p4 }
 0x225   : > { %p6075_p12 = por %p6074_p11, %p6073_p10 }
 0x226   : > { %p6071_p9 = pneg %p6070_p7 }
 0x228   : > { %p6076_p13 = pnand %p6075_p12, %p6071_p9 }
 0x22a   : > { %6079 = shalt.err (!%p6076_p13)
}
 0x22b   : > { %s6190_s15 = smov 128   ;;  %s6191_s17 = smov 8   ;;  %v4668_v1 = vmul.f32 %v4502_v17, %v4502_v17  ;;  %v4629_v3 = vadd.f32 %v4628_v35, %v4502_v17  ;;  %v4698_v61 = vadd.f32 %v4697_v59, %v4667_v25 }
 0x22c   : > { %5986 = dma.vmem_to_hbm [thread:$0]  (%p6266_p4), %s7771_s10, 4096, %s7769_s13, %s4708_s14, %s6190_s15, %s6190_s15, %s6191_s17  }
 0x22d   : > { %v4630_v27 = vrot.slane %v4629_v3, 4  ;;  %v4699_v2 = vadd.f32 %v4698_v61, %v4668_v1  ;;  %s7800_s27 = sand.u32 1, %s4912_s24   ;;  %s5231_s7 = sshll.u32 %s6178_s21, 4 }
 0x22e   : > { %s269_s8 = scalar_lea.vmem [#allocation6], %s7634_s29  ;;  %s7948_s13 = scalar_lea.vmem [#allocation8], %s7634_s29 }
 0x22f   : > { %v4631_v23 = vadd.f32 %v4630_v27, %v4629_v3  ;;  %v4700_v26 = vrot.slane %v4699_v2, 4  ;;  %s4747_s10 = sshll.u32 %s269_s8, 4  ;;  %s4761_s14 = sshll.u32 %s7948_s13, 4  ;;  %s7812_s10 = int_to_ptr.vmem [resolvable:$true] %s4747_s10  ;;  %s7819_s14 = int_to_ptr.vmem [resolvable:$true] %s4761_s14 }
 0x230   : > { %s7810_s12 = scalar_lea.hbm %s7896_s4, %s5231_s7  ;;  %s7817_s16 = scalar_lea.hbm %s7897_s5, %s5231_s7 }
 0x231   : > { %v4701_v5 = vadd.f32 %v4700_v26, %v4699_v2  ;;  %v4632_v58 = vrot.slane %v4631_v23, 2  ;;  %s4713_s15 = scalar_lea.sflag [#allocation7], %s7800_s27  ;;  %s6080_s17 = scalar_lea.vmem %s7812_s10, 16 }
 0x232   : > { %p6081_p0 = scmp.ne.s32.totalorder %s7812_s10, %s6080_s17  ;;  %s6192_s9 = smov [#allocation6]  }
 0x233   : > { %v4633_v57 = vadd.f32 %v4632_v58, %v4631_v23  ;;  %v4702_v49 = vrot.slane %v4701_v5, 2  ;;  %s6084_s11 = sshll.u32 %s6192_s9, 4  ;;  %s6085_s11 = int_to_ptr.vmem [resolvable:$false] %s6084_s11 }
 0x234   : > { %p6082_p1 = pnand %p6081_p0, %p6266_p4  ;;  %s6086_s25 = scalar_lea.vmem %s6085_s11, 32 }
 0x235   : > { %v4634_v20 = vrot.slane %v4633_v57, 1  ;;  %v4703_v54 = vadd.f32 %v4702_v49, %v4701_v5  ;;  %p6087_p3 = scmp.lt.s32.totalorder %s7812_s10, %s6085_s11  ;;  %p6088_p5 = scmp.lt.s32.totalorder %s6086_s25, %s6080_s17 }
 0x236   : > { %p6083_p2 = pneg %p6082_p1 }
 0x237   : > { %v4635_v47 = vadd.f32 %v4634_v20, %v4633_v57  ;;  %v4704_v63 = vrot.slane %v4703_v54, 1  ;;  %p6089_p6 = por %p6088_p5, %p6087_p3 }
 0x239   : > { %4636 = vst [vmem:[%s269_s8] sm:$0x1] %v4635_v47  ;;  %v4705_v7 = vadd.f32 %v4704_v63, %v4703_v54  ;;  %p6090_p7 = pnand %p6089_p6, %p6083_p2 }
 0x23b   : > { %6093 = shalt.err (!%p6090_p7)
}
 0x23c   : > { %s6094_s7 = scalar_lea.hbm %s7810_s12, 16  ;;  %s6098_s24 = scalar_lea.hbm %s7896_s4, 32 }
 0x23d   : > { %p6095_p9 = scmp.ne.s32.totalorder %s7810_s12, %s6094_s7  ;;  %p6099_p12 = scmp.lt.s32.totalorder %s7810_s12, %s7896_s4 }
 0x23e   : > { %p6100_p13 = scmp.lt.s32.totalorder %s6098_s24, %s6094_s7 }
 0x23f   : > { %p6096_p10 = pnand %p6095_p9, %p6266_p4 }
 0x240   : > { %p6101_p0 = por %p6100_p13, %p6099_p12 }
 0x241   : > { %p6097_p11 = pneg %p6096_p10 }
 0x243   : > { %p6102_p1 = pnand %p6101_p0, %p6097_p11 }
 0x245   : > { %6105 = shalt.err (!%p6102_p1)
}
 0x246   : > { %5987 = dma.vmem_to_hbm [thread:$0]  (%p6266_p4), %s7812_s10, 16, %s7810_s12, %s4713_s15  }
 0x247   : > { %s8121_s25 = scalar_lea.vmem [#allocation8], %s7634_s29  ;;  %s6106_s13 = scalar_lea.vmem %s7819_s14, 16 }
 0x248   : > { %4706 = vst [vmem:[%s8121_s25] sm:$0x1] %v4705_v7  ;;  %p6107_p2 = scmp.ne.s32.totalorder %s7819_s14, %s6106_s13  ;;  %s6193_s17 = smov [#allocation8]  }
 0x249   : > { %s6110_s11 = sshll.u32 %s6193_s17, 4  ;;  %s6111_s11 = int_to_ptr.vmem [resolvable:$false] %s6110_s11 }
 0x24a   : > { %p6108_p3 = pnand %p6107_p2, %p6266_p4  ;;  %s6112_s7 = scalar_lea.vmem %s6111_s11, 32 }
 0x24b   : > { %p6113_p6 = scmp.lt.s32.totalorder %s7819_s14, %s6111_s11  ;;  %p6114_p7 = scmp.lt.s32.totalorder %s6112_s7, %s6106_s13 }
 0x24c   : > { %p6109_p5 = pneg %p6108_p3 }
 0x24d   : > { %p6115_p9 = por %p6114_p7, %p6113_p6 }
 0x24f   : > { %p6116_p10 = pnand %p6115_p9, %p6109_p5 }
 0x251   : > { %6119 = shalt.err (!%p6116_p10)
}
 0x252   : > { %s6120_s29 = scalar_lea.hbm %s7817_s16, 16  ;;  %s6124_s8 = scalar_lea.hbm %s7897_s5, 32 }
 0x253   : > { %p6121_p11 = scmp.ne.s32.totalorder %s7817_s16, %s6120_s29  ;;  %p6125_p0 = scmp.lt.s32.totalorder %s7817_s16, %s7897_s5 }
 0x254   : > { %p6126_p1 = scmp.lt.s32.totalorder %s6124_s8, %s6120_s29 }
 0x255   : > { %p6122_p12 = pnand %p6121_p11, %p6266_p4 }
 0x256   : > { %p6127_p2 = por %p6126_p1, %p6125_p0 }
 0x257   : > { %p6123_p13 = pneg %p6122_p12 }
 0x259   : > { %p6128_p3 = pnand %p6127_p2, %p6123_p13 }
 0x25b   : > { %6131 = shalt.err (!%p6128_p3)
}
 0x25c   : > { %5988 = dma.vmem_to_hbm [thread:$0]  (%p6266_p4), %s7819_s14, 16, %s7817_s16, %s4713_s15  }
 0x25d PF: > { %p6002_p5 = scmp.ge.s32.totalorder %s6186_s23, 2  ;;  %s4773_s9 = sand.u32 1, %s6166_s18  }
 0x25e   : > { %s4774_s25 = scalar_lea.sflag [#allocation5], %s4773_s9 }
 0x25f   : > { %p5993_p6 = pnand %p6002_p5, %p6275_p8 }
 0x261   : > { %p5994_p7 = pneg %p5993_p6 }
 0x263   : > { %6157 = dma.done.wait (%p5994_p7), %s4774_s25, 4096  }
 0x264   : > { %6159 = vsyncadd (%p5994_p7), %s4774_s25, 4294963200  ;;  %s8122_s13 = sadd.s32 4294967294, %s6186_s23  }
 0x265   : > { %s4782_s28 = sand.u32 1, %s8122_s13  }
 0x266   : > { %s4783_s17 = scalar_lea.sflag [#allocation7], %s4782_s28 }
 0x267   : > { %6161 = dma.done.wait (%p5994_p7), %s4783_s17, 32  }
 0x268   : > { %6163 = vsyncadd (%p5994_p7), %s4783_s17, 4294967264  ;;  %s22_s23 = sadd.s32 1, %s6186_s23   ;;  %s8123_s18 = smov %s6170_s19 }
 0x269   : > { %p19_p4 = scmp.ge.s32.totalorder %s22_s23, 4   ;;  %s8124_s19 = smov %s6174_s20 }
 0x26a   : > { %s8125_s20 = smov %s6281_s6  ;;  %s8126_s21 = smov %s6182_s22 }
 0x26b   : > { %s8127_s22 = smov %s8129_s26  ;;  %21 = sbr.rel (!%p19_p4) target bundleno = 6 (0x6), region = 115 }
 0x270   :  { %4795 = vsyncpa [#allocation5], 1 }
 0x271   :  { %4797 = vsyncpa [#allocation5 + $0x1], 1 }
 0x272   :  { %4798 = vsyncpa [#allocation7], 1 }
 0x273   :  { %4800 = vsyncpa [#allocation7 + $0x1], 1 }

</bundles_post_ra>
